<compile_context>
chip_gen: v7x
topology: tpu7x:2x2x1
jax: 0.10.0
libtpu: 0.0.40
codegen_flags: <defaults>
</compile_context>

<pallas_src>
import functools

import jax
import jax.numpy as jnp
from jax import lax
from jax.experimental import pallas as pl
from jax.experimental.pallas import tpu as pltpu


# ---------------------------------------------------------------------------
# Fused kernel: projections + sequential TreeLSTM chain + readout + scoring.
# ---------------------------------------------------------------------------
def _tree_lstm_branch_kernel(feat_ref, iou_ref, c0_ref, sdown_ref, sup_ref,
                             w_cat_ref, bias_ref, u_cat_ref,
                             lin_w_ref, lin_b_ref,
                             vars_ref, cands_ref, gains_ref,
                             down_ref, up_ref, scores_ref,
                             proj_scr, h_scr, *, mu):
    N, H = h_scr.shape
    f32 = jnp.float32
    bf16 = jnp.bfloat16

    # ---- Stage 1: fused input projection, all biases folded in once. -------
    # Column layout of proj: [ Wfx + b_wf+b_uf+b_f | Wx_i | Wx_o | Wx_u ] + b_iou
    proj_scr[...] = (jnp.dot(feat_ref[...], w_cat_ref[...],
                             preferred_element_type=f32)
                     + bias_ref[...])

    def gates(iou_row, c_in):
        # iou_row: (1, 3H) pre-activations [i | o | u] (apply_node_func).
        i = jax.nn.sigmoid(iou_row[:, 0:H])
        o = jax.nn.sigmoid(iou_row[:, H:2 * H])
        u = jnp.tanh(iou_row[:, 2 * H:3 * H])
        c_new = i * u + c_in
        h_new = o * jnp.tanh(c_new)
        return h_new, c_new

    # ---- Stage 2: leaf node 0 (no incoming message). ------------------------
    # ndata['iou'] is still the per-node input iou; ndata['c'] the initial c.
    row0 = proj_scr[0:1, :]                                    # (1, 4H)
    h_prev, c_prev = gates(row0[:, H:] + iou_ref[0:1, :], c0_ref[0:1, :])
    h_scr[0:1, :] = h_prev

    u_cat = u_cat_ref[...]            # (H, 4H) bf16, [U_f | U_iou], loaded once

    # ---- Stage 3: sequential chain; recurrent state carried in vregs. -------
    def body(n, carry):
        h_p, c_p = carry
        u_all = jnp.dot(h_p.astype(bf16), u_cat,
                        preferred_element_type=f32)            # (1, 4H)
        row = proj_scr[pl.ds(n, 1), :] + u_all                 # (1, 4H)
        # reduce_func: f = sigmoid(Wfx + U_f(h) + b); c = f * c_child (1 child)
        f = jax.nn.sigmoid(row[:, 0:H])
        # apply_node_func with ndata['iou'] = U_iou(h) (input iou overwritten).
        h_n, c_n = gates(row[:, H:], f * c_p)
        h_scr[pl.ds(n, 1), :] = h_n                            # readout only
        return (h_n, c_n)

    # unroll=True -> straight-line code so the scheduler can hide next-row
    # loads under the serial MXU/EUP latency (N is small & static here).
    lax.fori_loop(1, N, body, (h_prev, c_prev), unroll=True)

    # ---- Stage 4: lane-dense readout + candidate-scoring epilogue. ----------
    h_all = h_scr[...]                                         # (N, H)
    contract = (((1,), (1,)), ((), ()))                        # A . B^T
    logits = (lax.dot_general(lin_w_ref[...], h_all, contract,
                              preferred_element_type=f32)
              + lin_b_ref[...])                                # (1, N)
    down = logits * sdown_ref[...]                             # (1, N)
    up = logits * sup_ref[...]
    down_ref[...] = down
    up_ref[...] = up

    # history[k, n] = 1 iff variable_chosen[n] == branch_cands[k]
    # (float equality of integer IDs -- exact for IDs < 2^24).
    hist = (cands_ref[...] == vars_ref[...]).astype(f32)       # (K, N)
    pd = lax.dot_general(down, hist, contract,
                         preferred_element_type=f32)           # (1, K)
    pu = lax.dot_general(up, hist, contract,
                         preferred_element_type=f32)           # (1, K)
    cnt = lax.dot_general(jnp.ones_like(down), hist, contract,
                          preferred_element_type=f32)          # (1, K)
    safe = jnp.maximum(cnt, 1.0)
    pd = pd / safe
    pu = pu / safe
    g_down = gains_ref[0:1, :]                                 # (1, K)
    g_up = gains_ref[1:2, :]
    with_hist = (1.0 - mu) * pd + mu * jnp.maximum(pd, pu)
    no_hist = (1.0 - mu) * g_down + mu * jnp.maximum(g_down, g_up)
    scores_ref[...] = jnp.where(cnt > 0.0, with_hist, no_hist)


# ---------------------------------------------------------------------------
# Wrapper: weight fusion, lane-dense layout plumbing, specs, traced argmax.
# ---------------------------------------------------------------------------
def tree_lstm_branch_forward(params, features, h, c, iou,
                             scaled_down, scaled_up, vars_chosen,
                             branch_cands, gains, mu=0.5):
    # Initial hidden state is overwritten by apply_node_func for every node
    # before it is ever read (messages use the post-apply h), so it never
    # enters the computation.
    del h
    f32 = jnp.float32
    bf16 = jnp.bfloat16
    N, X = features.shape
    H = c.shape[1]
    K = branch_cands.shape[0]

    # Fused weights / biases in [f | i | o | u] column order (hoisted out of
    # the kernel's serial loop).
    w_cat = jnp.concatenate([params["w_f"], params["w_iou"]], axis=1)    # (X,4H)
    u_cat = jnp.concatenate([params["u_f"], params["u_iou"]], axis=1)    # (H,4H)
    bias_row = jnp.concatenate(
        [params["b_wf"] + params["b_uf"] + params["b_f"], params["b_iou"]],
        axis=1).astype(f32)                                              # (1,4H)
    lin_w_row = params["lin_w"].reshape(1, H).astype(f32)
    lin_b = params["lin_b"].reshape(1, 1).astype(f32)

    in_arrays = [
        features.astype(bf16),                   # (N, X)  MXU operand -> bf16
        iou.astype(f32),                         # (N, 3H) per-node input iou
        c.astype(f32),                           # (N, H)  initial cell state
        scaled_down.reshape(1, N).astype(f32),   # (1, N)  lane-dense rows
        scaled_up.reshape(1, N).astype(f32),     # (1, N)
        w_cat.astype(bf16),                      # (X, 4H)
        bias_row,                                # (1, 4H)
        u_cat.astype(bf16),                      # (H, 4H)
        lin_w_row,                               # (1, H)
        lin_b,                                   # (1, 1)
        vars_chosen.reshape(1, N).astype(f32),   # (1, N)
        branch_cands.reshape(K, 1).astype(f32),  # (K, 1)
        gains.astype(f32).T,                     # (2, K)
    ]

    def full_spec(shape):
        return pl.BlockSpec(shape, lambda i: (0, 0))

    down, up, scores = pl.pallas_call(
        functools.partial(_tree_lstm_branch_kernel, mu=float(mu)),
        out_shape=(jax.ShapeDtypeStruct((1, N), f32),
                   jax.ShapeDtypeStruct((1, N), f32),
                   jax.ShapeDtypeStruct((1, K), f32)),
        grid=(1,),
        in_specs=[full_spec(a.shape) for a in in_arrays],
        out_specs=(full_spec((1, N)), full_spec((1, N)), full_spec((1, K))),
        scratch_shapes=[pltpu.VMEM((N, 4 * H), f32),   # fused projections
                        pltpu.VMEM((N, H), f32)],      # h (readout only)
        compiler_params=pltpu.CompilerParams(
            dimension_semantics=("arbitrary",)),
    )(*in_arrays)

    scores = scores.reshape(K)
    down_scores = down.reshape(N)
    up_scores = up.reshape(N)
    # torch loop uses strict '>' -> ties resolve to the earliest candidate,
    # matching argmax's first-occurrence behavior.  Returned as a traced
    # device scalar (no blocking device->host transfer per call).
    best_var = jnp.argmax(scores)
    return best_var, scores, down_scores, up_scores, vars_chosen


# ---------------------------------------------------------------------------
if __name__ == "__main__":
    key = jax.random.PRNGKey(0)
    N, X, H, K = 8, 16, 32, 4
    ks = jax.random.split(key, 16)

    def nrm(k, shape, s=0.1):
        return (s * jax.random.normal(k, shape)).astype(jnp.float32)

    params = {
        "w_iou": nrm(ks[0], (X, 3 * H)),              # W_iou (bias=False)
        "w_f":   nrm(ks[1], (X, H)),                  # W_f weight
        "b_wf":  nrm(ks[2], (1, H)),                  # W_f Linear bias
        "b_iou": jnp.zeros((1, 3 * H), jnp.float32),  # b_iou Parameter (zeros)
        "u_iou": nrm(ks[3], (H, 3 * H)),              # U_iou (bias=False)
        "u_f":   nrm(ks[4], (H, H)),                  # U_f weight
        "b_uf":  nrm(ks[5], (1, H)),                  # U_f Linear bias
        "b_f":   jnp.zeros((1, H), jnp.float32),      # b_f Parameter (zeros)
        "lin_w": nrm(ks[6], (H, 1)),                  # final Linear(h_size, 1)
        "lin_b": nrm(ks[7], (1, 1)),
    }

    features = nrm(ks[8], (N, X), 1.0)                # g.ndata['feature']
    h0 = jnp.zeros((N, H), jnp.float32)               # initial hidden state
    c0 = nrm(ks[9], (N, H), 0.1)                      # initial cell state
    iou_in = nrm(ks[10], (N, 3 * H), 0.1)             # per-node input iou
    scaled_down = nrm(ks[11], (N,), 1.0)              # scaled_improvement_down
    scaled_up = nrm(ks[12], (N,), 1.0)                # scaled_improvement_up
    vars_chosen = jax.random.randint(ks[13], (N,), 0, 3).astype(jnp.float32)
    branch_cands = jnp.array([0.0, 2.0, 5.0, 1.0], jnp.float32)  # 5: no history
    gains = jnp.abs(nrm(ks[14], (K, 2), 1.0))

    out = tree_lstm_branch_forward(params, features, h0, c0, iou_in,
                                   scaled_down, scaled_up, vars_chosen,
                                   branch_cands, gains)
    best_var, scores, down_scores, up_scores, vars_out = out
    jax.block_until_ready((best_var, scores, down_scores, up_scores))
    print("KERNEL_OK")
</pallas_src>

<mosaic_0001>
module attributes {stable_mosaic.version = 11 : i64} {
  func.func @_tree_lstm_branch_kernel(%arg0: i32, %arg1: memref<8x16xbf16, #tpu.memory_space<vmem>>, %arg2: memref<8x96xf32, #tpu.memory_space<vmem>>, %arg3: memref<8x32xf32, #tpu.memory_space<vmem>>, %arg4: memref<1x8xf32, #tpu.memory_space<vmem>>, %arg5: memref<1x8xf32, #tpu.memory_space<vmem>>, %arg6: memref<16x128xbf16, #tpu.memory_space<vmem>>, %arg7: memref<1x128xf32, #tpu.memory_space<vmem>>, %arg8: memref<32x128xbf16, #tpu.memory_space<vmem>>, %arg9: memref<1x32xf32, #tpu.memory_space<vmem>>, %arg10: memref<1x1xf32, #tpu.memory_space<vmem>>, %arg11: memref<1x8xf32, #tpu.memory_space<vmem>>, %arg12: memref<4x1xf32, #tpu.memory_space<vmem>>, %arg13: memref<2x4xf32, #tpu.memory_space<vmem>>, %arg14: memref<1x8xf32, #tpu.memory_space<vmem>>, %arg15: memref<1x8xf32, #tpu.memory_space<vmem>>, %arg16: memref<1x4xf32, #tpu.memory_space<vmem>>, %arg17: memref<8x128xf32, #tpu.memory_space<vmem>>, %arg18: memref<8x32xf32, #tpu.memory_space<vmem>>) attributes {dimension_semantics = [#tpu.dimension_semantics<arbitrary>], iteration_bounds = array<i64: 1>, scalar_prefetch = 0 : i64, scratch_operands = 2 : i64, tpu.core_type = #tpu.core_type<tc>, window_params = [{pipeline_mode = #tpu.pipeline_mode<synchronous>, transform_indices = @transform_0, window_bounds = array<i64: 8, 16>}, {pipeline_mode = #tpu.pipeline_mode<synchronous>, transform_indices = @transform_1, window_bounds = array<i64: 8, 96>}, {pipeline_mode = #tpu.pipeline_mode<synchronous>, transform_indices = @transform_2, window_bounds = array<i64: 8, 32>}, {pipeline_mode = #tpu.pipeline_mode<synchronous>, transform_indices = @transform_3, window_bounds = array<i64: 1, 8>}, {pipeline_mode = #tpu.pipeline_mode<synchronous>, transform_indices = @transform_4, window_bounds = array<i64: 1, 8>}, {pipeline_mode = #tpu.pipeline_mode<synchronous>, transform_indices = @transform_5, window_bounds = array<i64: 16, 128>}, {pipeline_mode = #tpu.pipeline_mode<synchronous>, transform_indices = @transform_6, window_bounds = array<i64: 1, 128>}, {pipeline_mode = #tpu.pipeline_mode<synchronous>, transform_indices = @transform_7, window_bounds = array<i64: 32, 128>}, {pipeline_mode = #tpu.pipeline_mode<synchronous>, transform_indices = @transform_8, window_bounds = array<i64: 1, 32>}, {pipeline_mode = #tpu.pipeline_mode<synchronous>, transform_indices = @transform_9, window_bounds = array<i64: 1, 1>}, {pipeline_mode = #tpu.pipeline_mode<synchronous>, transform_indices = @transform_10, window_bounds = array<i64: 1, 8>}, {pipeline_mode = #tpu.pipeline_mode<synchronous>, transform_indices = @transform_11, window_bounds = array<i64: 4, 1>}, {pipeline_mode = #tpu.pipeline_mode<synchronous>, transform_indices = @transform_12, window_bounds = array<i64: 2, 4>}, {pipeline_mode = #tpu.pipeline_mode<synchronous>, transform_indices = @transform_13, window_bounds = array<i64: 1, 8>}, {pipeline_mode = #tpu.pipeline_mode<synchronous>, transform_indices = @transform_14, window_bounds = array<i64: 1, 8>}, {pipeline_mode = #tpu.pipeline_mode<synchronous>, transform_indices = @transform_15, window_bounds = array<i64: 1, 4>}]} {
    %c0 = arith.constant 0 : index
    %c0_0 = arith.constant 0 : index
    %0 = vector.load %arg1[%c0, %c0_0] : memref<8x16xbf16, #tpu.memory_space<vmem>>, vector<8x16xbf16>
    %c0_1 = arith.constant 0 : index
    %c0_2 = arith.constant 0 : index
    %1 = vector.load %arg6[%c0_1, %c0_2] : memref<16x128xbf16, #tpu.memory_space<vmem>>, vector<16x128xbf16>
    %cst = arith.constant dense<0.000000e+00> : vector<8x128xf32>
    %2 = tpu.matmul %0, %1, %cst {dimension_numbers = #tpu.dot_dimension_numbers<[1], [0], [0], [1], [0, 0, 1, 1], [], []>} : vector<8x16xbf16>, vector<16x128xbf16>, vector<8x128xf32> -> vector<8x128xf32>
    %c0_3 = arith.constant 0 : index
    %c0_4 = arith.constant 0 : index
    %3 = vector.load %arg7[%c0_3, %c0_4] : memref<1x128xf32, #tpu.memory_space<vmem>>, vector<1x128xf32>
    %4 = vector.broadcast %3 : vector<1x128xf32> to vector<8x128xf32>
    %5 = arith.addf %2, %4 : vector<8x128xf32>
    %c0_5 = arith.constant 0 : index
    %c0_6 = arith.constant 0 : index
    %6 = vector.load %arg17[%c0_5, %c0_6] : memref<8x128xf32, #tpu.memory_space<vmem>>, vector<8x128xf32>
    tpu.vector_store %arg17[%c0_5, %c0_6], %5 {strides = array<i32>} : memref<8x128xf32, #tpu.memory_space<vmem>>, vector<8x128xf32>,
    %c0_7 = arith.constant 0 : index
    %c0_8 = arith.constant 0 : index
    %7 = vector.load %arg17[%c0_7, %c0_8] : memref<8x128xf32, #tpu.memory_space<vmem>>, vector<1x128xf32>
    %8 = vector.extract_strided_slice %7 {offsets = [0, 32], sizes = [1, 96], strides = [1, 1]} : vector<1x128xf32> to vector<1x96xf32>
    %c0_9 = arith.constant 0 : index
    %c0_10 = arith.constant 0 : index
    %9 = vector.load %arg2[%c0_9, %c0_10] : memref<8x96xf32, #tpu.memory_space<vmem>>, vector<1x96xf32>
    %10 = arith.addf %8, %9 : vector<1x96xf32>
    %c0_11 = arith.constant 0 : index
    %c0_12 = arith.constant 0 : index
    %11 = vector.load %arg3[%c0_11, %c0_12] : memref<8x32xf32, #tpu.memory_space<vmem>>, vector<1x32xf32>
    %12 = vector.extract_strided_slice %10 {offsets = [0, 0], sizes = [1, 32], strides = [1, 1]} : vector<1x96xf32> to vector<1x32xf32>
    %13 = arith.negf %12 : vector<1x32xf32>
    %14 = math.exp %13 : vector<1x32xf32>
    %cst_13 = arith.constant 1.000000e+00 : f32
    %15 = vector.broadcast %cst_13 : f32 to vector<1x32xf32>
    %16 = arith.addf %15, %14 : vector<1x32xf32>
    %17 = arith.divf %15, %16 : vector<1x32xf32>
    %18 = vector.extract_strided_slice %10 {offsets = [0, 32], sizes = [1, 32], strides = [1, 1]} : vector<1x96xf32> to vector<1x32xf32>
    %19 = arith.negf %18 : vector<1x32xf32>
    %20 = math.exp %19 : vector<1x32xf32>
    %cst_14 = arith.constant 1.000000e+00 : f32
    %21 = vector.broadcast %cst_14 : f32 to vector<1x32xf32>
    %22 = arith.addf %21, %20 : vector<1x32xf32>
    %23 = arith.divf %21, %22 : vector<1x32xf32>
    %24 = vector.extract_strided_slice %10 {offsets = [0, 64], sizes = [1, 32], strides = [1, 1]} : vector<1x96xf32> to vector<1x32xf32>
    %25 = math.tanh %24 : vector<1x32xf32>
    %26 = arith.mulf %17, %25 : vector<1x32xf32>
    %27 = arith.addf %26, %11 : vector<1x32xf32>
    %28 = math.tanh %27 : vector<1x32xf32>
    %29 = arith.mulf %23, %28 : vector<1x32xf32>
    %c0_15 = arith.constant 0 : index
    %c0_16 = arith.constant 0 : index
    %30 = vector.load %arg18[%c0_15, %c0_16] : memref<8x32xf32, #tpu.memory_space<vmem>>, vector<1x32xf32>
    tpu.vector_store %arg18[%c0_15, %c0_16], %29 {strides = array<i32>} : memref<8x32xf32, #tpu.memory_space<vmem>>, vector<1x32xf32>,
    %c0_17 = arith.constant 0 : index
    %c0_18 = arith.constant 0 : index
    %31 = vector.load %arg8[%c0_17, %c0_18] : memref<32x128xbf16, #tpu.memory_space<vmem>>, vector<32x128xbf16>
    %c1_i32 = arith.constant 1 : i32
    %32 = arith.truncf %29 : vector<1x32xf32> to vector<1x32xbf16>
    %cst_19 = arith.constant dense<0.000000e+00> : vector<1x128xf32>
    %33 = tpu.matmul %32, %31, %cst_19 {dimension_numbers = #tpu.dot_dimension_numbers<[1], [0], [0], [1], [0, 0, 1, 1], [], []>} : vector<1x32xbf16>, vector<32x128xbf16>, vector<1x128xf32> -> vector<1x128xf32>
    %34 = arith.index_cast %c1_i32 : i32 to index
    %c0_20 = arith.constant 0 : index
    %35 = vector.load %arg17[%34, %c0_20] : memref<8x128xf32, #tpu.memory_space<vmem>>, vector<1x128xf32>
    %36 = arith.addf %35, %33 : vector<1x128xf32>
    %37 = vector.extract_strided_slice %36 {offsets = [0, 0], sizes = [1, 32], strides = [1, 1]} : vector<1x128xf32> to vector<1x32xf32>
    %38 = arith.negf %37 : vector<1x32xf32>
    %39 = math.exp %38 : vector<1x32xf32>
    %cst_21 = arith.constant 1.000000e+00 : f32
    %40 = vector.broadcast %cst_21 : f32 to vector<1x32xf32>
    %41 = arith.addf %40, %39 : vector<1x32xf32>
    %42 = arith.divf %40, %41 : vector<1x32xf32>
    %43 = vector.extract_strided_slice %36 {offsets = [0, 32], sizes = [1, 96], strides = [1, 1]} : vector<1x128xf32> to vector<1x96xf32>
    %44 = arith.mulf %42, %27 : vector<1x32xf32>
    %45 = vector.extract_strided_slice %43 {offsets = [0, 0], sizes = [1, 32], strides = [1, 1]} : vector<1x96xf32> to vector<1x32xf32>
    %46 = arith.negf %45 : vector<1x32xf32>
    %47 = math.exp %46 : vector<1x32xf32>
    %cst_22 = arith.constant 1.000000e+00 : f32
    %48 = vector.broadcast %cst_22 : f32 to vector<1x32xf32>
    %49 = arith.addf %48, %47 : vector<1x32xf32>
    %50 = arith.divf %48, %49 : vector<1x32xf32>
    %51 = vector.extract_strided_slice %43 {offsets = [0, 32], sizes = [1, 32], strides = [1, 1]} : vector<1x96xf32> to vector<1x32xf32>
    %52 = arith.negf %51 : vector<1x32xf32>
    %53 = math.exp %52 : vector<1x32xf32>
    %cst_23 = arith.constant 1.000000e+00 : f32
    %54 = vector.broadcast %cst_23 : f32 to vector<1x32xf32>
    %55 = arith.addf %54, %53 : vector<1x32xf32>
    %56 = arith.divf %54, %55 : vector<1x32xf32>
    %57 = vector.extract_strided_slice %43 {offsets = [0, 64], sizes = [1, 32], strides = [1, 1]} : vector<1x96xf32> to vector<1x32xf32>
    %58 = math.tanh %57 : vector<1x32xf32>
    %59 = arith.mulf %50, %58 : vector<1x32xf32>
    %60 = arith.addf %59, %44 : vector<1x32xf32>
    %61 = math.tanh %60 : vector<1x32xf32>
    %62 = arith.mulf %56, %61 : vector<1x32xf32>
    %63 = arith.index_cast %c1_i32 : i32 to index
    %c0_24 = arith.constant 0 : index
    %64 = vector.load %arg18[%63, %c0_24] : memref<8x32xf32, #tpu.memory_space<vmem>>, vector<1x32xf32>
    tpu.vector_store %arg18[%63, %c0_24], %62 {strides = array<i32>} : memref<8x32xf32, #tpu.memory_space<vmem>>, vector<1x32xf32>,
    %c2_i32 = arith.constant 2 : i32
    %65 = arith.truncf %62 : vector<1x32xf32> to vector<1x32xbf16>
    %cst_25 = arith.constant dense<0.000000e+00> : vector<1x128xf32>
    %66 = tpu.matmul %65, %31, %cst_25 {dimension_numbers = #tpu.dot_dimension_numbers<[1], [0], [0], [1], [0, 0, 1, 1], [], []>} : vector<1x32xbf16>, vector<32x128xbf16>, vector<1x128xf32> -> vector<1x128xf32>
    %67 = arith.index_cast %c2_i32 : i32 to index
    %c0_26 = arith.constant 0 : index
    %68 = vector.load %arg17[%67, %c0_26] : memref<8x128xf32, #tpu.memory_space<vmem>>, vector<1x128xf32>
    %69 = arith.addf %68, %66 : vector<1x128xf32>
    %70 = vector.extract_strided_slice %69 {offsets = [0, 0], sizes = [1, 32], strides = [1, 1]} : vector<1x128xf32> to vector<1x32xf32>
    %71 = arith.negf %70 : vector<1x32xf32>
    %72 = math.exp %71 : vector<1x32xf32>
    %cst_27 = arith.constant 1.000000e+00 : f32
    %73 = vector.broadcast %cst_27 : f32 to vector<1x32xf32>
    %74 = arith.addf %73, %72 : vector<1x32xf32>
    %75 = arith.divf %73, %74 : vector<1x32xf32>
    %76 = vector.extract_strided_slice %69 {offsets = [0, 32], sizes = [1, 96], strides = [1, 1]} : vector<1x128xf32> to vector<1x96xf32>
    %77 = arith.mulf %75, %60 : vector<1x32xf32>
    %78 = vector.extract_strided_slice %76 {offsets = [0, 0], sizes = [1, 32], strides = [1, 1]} : vector<1x96xf32> to vector<1x32xf32>
    %79 = arith.negf %78 : vector<1x32xf32>
    %80 = math.exp %79 : vector<1x32xf32>
    %cst_28 = arith.constant 1.000000e+00 : f32
    %81 = vector.broadcast %cst_28 : f32 to vector<1x32xf32>
    %82 = arith.addf %81, %80 : vector<1x32xf32>
    %83 = arith.divf %81, %82 : vector<1x32xf32>
    %84 = vector.extract_strided_slice %76 {offsets = [0, 32], sizes = [1, 32], strides = [1, 1]} : vector<1x96xf32> to vector<1x32xf32>
    %85 = arith.negf %84 : vector<1x32xf32>
    %86 = math.exp %85 : vector<1x32xf32>
    %cst_29 = arith.constant 1.000000e+00 : f32
    %87 = vector.broadcast %cst_29 : f32 to vector<1x32xf32>
    %88 = arith.addf %87, %86 : vector<1x32xf32>
    %89 = arith.divf %87, %88 : vector<1x32xf32>
    %90 = vector.extract_strided_slice %76 {offsets = [0, 64], sizes = [1, 32], strides = [1, 1]} : vector<1x96xf32> to vector<1x32xf32>
    %91 = math.tanh %90 : vector<1x32xf32>
    %92 = arith.mulf %83, %91 : vector<1x32xf32>
    %93 = arith.addf %92, %77 : vector<1x32xf32>
    %94 = math.tanh %93 : vector<1x32xf32>
    %95 = arith.mulf %89, %94 : vector<1x32xf32>
    %96 = arith.index_cast %c2_i32 : i32 to index
    %c0_30 = arith.constant 0 : index
    %97 = vector.load %arg18[%96, %c0_30] : memref<8x32xf32, #tpu.memory_space<vmem>>, vector<1x32xf32>
    tpu.vector_store %arg18[%96, %c0_30], %95 {strides = array<i32>} : memref<8x32xf32, #tpu.memory_space<vmem>>, vector<1x32xf32>,
    %c3_i32 = arith.constant 3 : i32
    %98 = arith.truncf %95 : vector<1x32xf32> to vector<1x32xbf16>
    %cst_31 = arith.constant dense<0.000000e+00> : vector<1x128xf32>
    %99 = tpu.matmul %98, %31, %cst_31 {dimension_numbers = #tpu.dot_dimension_numbers<[1], [0], [0], [1], [0, 0, 1, 1], [], []>} : vector<1x32xbf16>, vector<32x128xbf16>, vector<1x128xf32> -> vector<1x128xf32>
    %100 = arith.index_cast %c3_i32 : i32 to index
    %c0_32 = arith.constant 0 : index
    %101 = vector.load %arg17[%100, %c0_32] : memref<8x128xf32, #tpu.memory_space<vmem>>, vector<1x128xf32>
    %102 = arith.addf %101, %99 : vector<1x128xf32>
    %103 = vector.extract_strided_slice %102 {offsets = [0, 0], sizes = [1, 32], strides = [1, 1]} : vector<1x128xf32> to vector<1x32xf32>
    %104 = arith.negf %103 : vector<1x32xf32>
    %105 = math.exp %104 : vector<1x32xf32>
    %cst_33 = arith.constant 1.000000e+00 : f32
    %106 = vector.broadcast %cst_33 : f32 to vector<1x32xf32>
    %107 = arith.addf %106, %105 : vector<1x32xf32>
    %108 = arith.divf %106, %107 : vector<1x32xf32>
    %109 = vector.extract_strided_slice %102 {offsets = [0, 32], sizes = [1, 96], strides = [1, 1]} : vector<1x128xf32> to vector<1x96xf32>
    %110 = arith.mulf %108, %93 : vector<1x32xf32>
    %111 = vector.extract_strided_slice %109 {offsets = [0, 0], sizes = [1, 32], strides = [1, 1]} : vector<1x96xf32> to vector<1x32xf32>
    %112 = arith.negf %111 : vector<1x32xf32>
    %113 = math.exp %112 : vector<1x32xf32>
    %cst_34 = arith.constant 1.000000e+00 : f32
    %114 = vector.broadcast %cst_34 : f32 to vector<1x32xf32>
    %115 = arith.addf %114, %113 : vector<1x32xf32>
    %116 = arith.divf %114, %115 : vector<1x32xf32>
    %117 = vector.extract_strided_slice %109 {offsets = [0, 32], sizes = [1, 32], strides = [1, 1]} : vector<1x96xf32> to vector<1x32xf32>
    %118 = arith.negf %117 : vector<1x32xf32>
    %119 = math.exp %118 : vector<1x32xf32>
    %cst_35 = arith.constant 1.000000e+00 : f32
    %120 = vector.broadcast %cst_35 : f32 to vector<1x32xf32>
    %121 = arith.addf %120, %119 : vector<1x32xf32>
    %122 = arith.divf %120, %121 : vector<1x32xf32>
    %123 = vector.extract_strided_slice %109 {offsets = [0, 64], sizes = [1, 32], strides = [1, 1]} : vector<1x96xf32> to vector<1x32xf32>
    %124 = math.tanh %123 : vector<1x32xf32>
    %125 = arith.mulf %116, %124 : vector<1x32xf32>
    %126 = arith.addf %125, %110 : vector<1x32xf32>
    %127 = math.tanh %126 : vector<1x32xf32>
    %128 = arith.mulf %122, %127 : vector<1x32xf32>
    %129 = arith.index_cast %c3_i32 : i32 to index
    %c0_36 = arith.constant 0 : index
    %130 = vector.load %arg18[%129, %c0_36] : memref<8x32xf32, #tpu.memory_space<vmem>>, vector<1x32xf32>
    tpu.vector_store %arg18[%129, %c0_36], %128 {strides = array<i32>} : memref<8x32xf32, #tpu.memory_space<vmem>>, vector<1x32xf32>,
    %c4_i32 = arith.constant 4 : i32
    %131 = arith.truncf %128 : vector<1x32xf32> to vector<1x32xbf16>
    %cst_37 = arith.constant dense<0.000000e+00> : vector<1x128xf32>
    %132 = tpu.matmul %131, %31, %cst_37 {dimension_numbers = #tpu.dot_dimension_numbers<[1], [0], [0], [1], [0, 0, 1, 1], [], []>} : vector<1x32xbf16>, vector<32x128xbf16>, vector<1x128xf32> -> vector<1x128xf32>
    %133 = arith.index_cast %c4_i32 : i32 to index
    %c0_38 = arith.constant 0 : index
    %134 = vector.load %arg17[%133, %c0_38] : memref<8x128xf32, #tpu.memory_space<vmem>>, vector<1x128xf32>
    %135 = arith.addf %134, %132 : vector<1x128xf32>
    %136 = vector.extract_strided_slice %135 {offsets = [0, 0], sizes = [1, 32], strides = [1, 1]} : vector<1x128xf32> to vector<1x32xf32>
    %137 = arith.negf %136 : vector<1x32xf32>
    %138 = math.exp %137 : vector<1x32xf32>
    %cst_39 = arith.constant 1.000000e+00 : f32
    %139 = vector.broadcast %cst_39 : f32 to vector<1x32xf32>
    %140 = arith.addf %139, %138 : vector<1x32xf32>
    %141 = arith.divf %139, %140 : vector<1x32xf32>
    %142 = vector.extract_strided_slice %135 {offsets = [0, 32], sizes = [1, 96], strides = [1, 1]} : vector<1x128xf32> to vector<1x96xf32>
    %143 = arith.mulf %141, %126 : vector<1x32xf32>
    %144 = vector.extract_strided_slice %142 {offsets = [0, 0], sizes = [1, 32], strides = [1, 1]} : vector<1x96xf32> to vector<1x32xf32>
    %145 = arith.negf %144 : vector<1x32xf32>
    %146 = math.exp %145 : vector<1x32xf32>
    %cst_40 = arith.constant 1.000000e+00 : f32
    %147 = vector.broadcast %cst_40 : f32 to vector<1x32xf32>
    %148 = arith.addf %147, %146 : vector<1x32xf32>
    %149 = arith.divf %147, %148 : vector<1x32xf32>
    %150 = vector.extract_strided_slice %142 {offsets = [0, 32], sizes = [1, 32], strides = [1, 1]} : vector<1x96xf32> to vector<1x32xf32>
    %151 = arith.negf %150 : vector<1x32xf32>
    %152 = math.exp %151 : vector<1x32xf32>
    %cst_41 = arith.constant 1.000000e+00 : f32
    %153 = vector.broadcast %cst_41 : f32 to vector<1x32xf32>
    %154 = arith.addf %153, %152 : vector<1x32xf32>
    %155 = arith.divf %153, %154 : vector<1x32xf32>
    %156 = vector.extract_strided_slice %142 {offsets = [0, 64], sizes = [1, 32], strides = [1, 1]} : vector<1x96xf32> to vector<1x32xf32>
    %157 = math.tanh %156 : vector<1x32xf32>
    %158 = arith.mulf %149, %157 : vector<1x32xf32>
    %159 = arith.addf %158, %143 : vector<1x32xf32>
    %160 = math.tanh %159 : vector<1x32xf32>
    %161 = arith.mulf %155, %160 : vector<1x32xf32>
    %162 = arith.index_cast %c4_i32 : i32 to index
    %c0_42 = arith.constant 0 : index
    %163 = vector.load %arg18[%162, %c0_42] : memref<8x32xf32, #tpu.memory_space<vmem>>, vector<1x32xf32>
    tpu.vector_store %arg18[%162, %c0_42], %161 {strides = array<i32>} : memref<8x32xf32, #tpu.memory_space<vmem>>, vector<1x32xf32>,
    %c5_i32 = arith.constant 5 : i32
    %164 = arith.truncf %161 : vector<1x32xf32> to vector<1x32xbf16>
    %cst_43 = arith.constant dense<0.000000e+00> : vector<1x128xf32>
    %165 = tpu.matmul %164, %31, %cst_43 {dimension_numbers = #tpu.dot_dimension_numbers<[1], [0], [0], [1], [0, 0, 1, 1], [], []>} : vector<1x32xbf16>, vector<32x128xbf16>, vector<1x128xf32> -> vector<1x128xf32>
    %166 = arith.index_cast %c5_i32 : i32 to index
    %c0_44 = arith.constant 0 : index
    %167 = vector.load %arg17[%166, %c0_44] : memref<8x128xf32, #tpu.memory_space<vmem>>, vector<1x128xf32>
    %168 = arith.addf %167, %165 : vector<1x128xf32>
    %169 = vector.extract_strided_slice %168 {offsets = [0, 0], sizes = [1, 32], strides = [1, 1]} : vector<1x128xf32> to vector<1x32xf32>
    %170 = arith.negf %169 : vector<1x32xf32>
    %171 = math.exp %170 : vector<1x32xf32>
    %cst_45 = arith.constant 1.000000e+00 : f32
    %172 = vector.broadcast %cst_45 : f32 to vector<1x32xf32>
    %173 = arith.addf %172, %171 : vector<1x32xf32>
    %174 = arith.divf %172, %173 : vector<1x32xf32>
    %175 = vector.extract_strided_slice %168 {offsets = [0, 32], sizes = [1, 96], strides = [1, 1]} : vector<1x128xf32> to vector<1x96xf32>
    %176 = arith.mulf %174, %159 : vector<1x32xf32>
    %177 = vector.extract_strided_slice %175 {offsets = [0, 0], sizes = [1, 32], strides = [1, 1]} : vector<1x96xf32> to vector<1x32xf32>
    %178 = arith.negf %177 : vector<1x32xf32>
    %179 = math.exp %178 : vector<1x32xf32>
    %cst_46 = arith.constant 1.000000e+00 : f32
    %180 = vector.broadcast %cst_46 : f32 to vector<1x32xf32>
    %181 = arith.addf %180, %179 : vector<1x32xf32>
    %182 = arith.divf %180, %181 : vector<1x32xf32>
    %183 = vector.extract_strided_slice %175 {offsets = [0, 32], sizes = [1, 32], strides = [1, 1]} : vector<1x96xf32> to vector<1x32xf32>
    %184 = arith.negf %183 : vector<1x32xf32>
    %185 = math.exp %184 : vector<1x32xf32>
    %cst_47 = arith.constant 1.000000e+00 : f32
    %186 = vector.broadcast %cst_47 : f32 to vector<1x32xf32>
    %187 = arith.addf %186, %185 : vector<1x32xf32>
    %188 = arith.divf %186, %187 : vector<1x32xf32>
    %189 = vector.extract_strided_slice %175 {offsets = [0, 64], sizes = [1, 32], strides = [1, 1]} : vector<1x96xf32> to vector<1x32xf32>
    %190 = math.tanh %189 : vector<1x32xf32>
    %191 = arith.mulf %182, %190 : vector<1x32xf32>
    %192 = arith.addf %191, %176 : vector<1x32xf32>
    %193 = math.tanh %192 : vector<1x32xf32>
    %194 = arith.mulf %188, %193 : vector<1x32xf32>
    %195 = arith.index_cast %c5_i32 : i32 to index
    %c0_48 = arith.constant 0 : index
    %196 = vector.load %arg18[%195, %c0_48] : memref<8x32xf32, #tpu.memory_space<vmem>>, vector<1x32xf32>
    tpu.vector_store %arg18[%195, %c0_48], %194 {strides = array<i32>} : memref<8x32xf32, #tpu.memory_space<vmem>>, vector<1x32xf32>,
    %c6_i32 = arith.constant 6 : i32
    %197 = arith.truncf %194 : vector<1x32xf32> to vector<1x32xbf16>
    %cst_49 = arith.constant dense<0.000000e+00> : vector<1x128xf32>
    %198 = tpu.matmul %197, %31, %cst_49 {dimension_numbers = #tpu.dot_dimension_numbers<[1], [0], [0], [1], [0, 0, 1, 1], [], []>} : vector<1x32xbf16>, vector<32x128xbf16>, vector<1x128xf32> -> vector<1x128xf32>
    %199 = arith.index_cast %c6_i32 : i32 to index
    %c0_50 = arith.constant 0 : index
    %200 = vector.load %arg17[%199, %c0_50] : memref<8x128xf32, #tpu.memory_space<vmem>>, vector<1x128xf32>
    %201 = arith.addf %200, %198 : vector<1x128xf32>
    %202 = vector.extract_strided_slice %201 {offsets = [0, 0], sizes = [1, 32], strides = [1, 1]} : vector<1x128xf32> to vector<1x32xf32>
    %203 = arith.negf %202 : vector<1x32xf32>
    %204 = math.exp %203 : vector<1x32xf32>
    %cst_51 = arith.constant 1.000000e+00 : f32
    %205 = vector.broadcast %cst_51 : f32 to vector<1x32xf32>
    %206 = arith.addf %205, %204 : vector<1x32xf32>
    %207 = arith.divf %205, %206 : vector<1x32xf32>
    %208 = vector.extract_strided_slice %201 {offsets = [0, 32], sizes = [1, 96], strides = [1, 1]} : vector<1x128xf32> to vector<1x96xf32>
    %209 = arith.mulf %207, %192 : vector<1x32xf32>
    %210 = vector.extract_strided_slice %208 {offsets = [0, 0], sizes = [1, 32], strides = [1, 1]} : vector<1x96xf32> to vector<1x32xf32>
    %211 = arith.negf %210 : vector<1x32xf32>
    %212 = math.exp %211 : vector<1x32xf32>
    %cst_52 = arith.constant 1.000000e+00 : f32
    %213 = vector.broadcast %cst_52 : f32 to vector<1x32xf32>
    %214 = arith.addf %213, %212 : vector<1x32xf32>
    %215 = arith.divf %213, %214 : vector<1x32xf32>
    %216 = vector.extract_strided_slice %208 {offsets = [0, 32], sizes = [1, 32], strides = [1, 1]} : vector<1x96xf32> to vector<1x32xf32>
    %217 = arith.negf %216 : vector<1x32xf32>
    %218 = math.exp %217 : vector<1x32xf32>
    %cst_53 = arith.constant 1.000000e+00 : f32
    %219 = vector.broadcast %cst_53 : f32 to vector<1x32xf32>
    %220 = arith.addf %219, %218 : vector<1x32xf32>
    %221 = arith.divf %219, %220 : vector<1x32xf32>
    %222 = vector.extract_strided_slice %208 {offsets = [0, 64], sizes = [1, 32], strides = [1, 1]} : vector<1x96xf32> to vector<1x32xf32>
    %223 = math.tanh %222 : vector<1x32xf32>
    %224 = arith.mulf %215, %223 : vector<1x32xf32>
    %225 = arith.addf %224, %209 : vector<1x32xf32>
    %226 = math.tanh %225 : vector<1x32xf32>
    %227 = arith.mulf %221, %226 : vector<1x32xf32>
    %228 = arith.index_cast %c6_i32 : i32 to index
    %c0_54 = arith.constant 0 : index
    %229 = vector.load %arg18[%228, %c0_54] : memref<8x32xf32, #tpu.memory_space<vmem>>, vector<1x32xf32>
    tpu.vector_store %arg18[%228, %c0_54], %227 {strides = array<i32>} : memref<8x32xf32, #tpu.memory_space<vmem>>, vector<1x32xf32>,
    %c7_i32 = arith.constant 7 : i32
    %230 = arith.truncf %227 : vector<1x32xf32> to vector<1x32xbf16>
    %cst_55 = arith.constant dense<0.000000e+00> : vector<1x128xf32>
    %231 = tpu.matmul %230, %31, %cst_55 {dimension_numbers = #tpu.dot_dimension_numbers<[1], [0], [0], [1], [0, 0, 1, 1], [], []>} : vector<1x32xbf16>, vector<32x128xbf16>, vector<1x128xf32> -> vector<1x128xf32>
    %232 = arith.index_cast %c7_i32 : i32 to index
    %c0_56 = arith.constant 0 : index
    %233 = vector.load %arg17[%232, %c0_56] : memref<8x128xf32, #tpu.memory_space<vmem>>, vector<1x128xf32>
    %234 = arith.addf %233, %231 : vector<1x128xf32>
    %235 = vector.extract_strided_slice %234 {offsets = [0, 0], sizes = [1, 32], strides = [1, 1]} : vector<1x128xf32> to vector<1x32xf32>
    %236 = arith.negf %235 : vector<1x32xf32>
    %237 = math.exp %236 : vector<1x32xf32>
    %cst_57 = arith.constant 1.000000e+00 : f32
    %238 = vector.broadcast %cst_57 : f32 to vector<1x32xf32>
    %239 = arith.addf %238, %237 : vector<1x32xf32>
    %240 = arith.divf %238, %239 : vector<1x32xf32>
    %241 = vector.extract_strided_slice %234 {offsets = [0, 32], sizes = [1, 96], strides = [1, 1]} : vector<1x128xf32> to vector<1x96xf32>
    %242 = arith.mulf %240, %225 : vector<1x32xf32>
    %243 = vector.extract_strided_slice %241 {offsets = [0, 0], sizes = [1, 32], strides = [1, 1]} : vector<1x96xf32> to vector<1x32xf32>
    %244 = arith.negf %243 : vector<1x32xf32>
    %245 = math.exp %244 : vector<1x32xf32>
    %cst_58 = arith.constant 1.000000e+00 : f32
    %246 = vector.broadcast %cst_58 : f32 to vector<1x32xf32>
    %247 = arith.addf %246, %245 : vector<1x32xf32>
    %248 = arith.divf %246, %247 : vector<1x32xf32>
    %249 = vector.extract_strided_slice %241 {offsets = [0, 32], sizes = [1, 32], strides = [1, 1]} : vector<1x96xf32> to vector<1x32xf32>
    %250 = arith.negf %249 : vector<1x32xf32>
    %251 = math.exp %250 : vector<1x32xf32>
    %cst_59 = arith.constant 1.000000e+00 : f32
    %252 = vector.broadcast %cst_59 : f32 to vector<1x32xf32>
    %253 = arith.addf %252, %251 : vector<1x32xf32>
    %254 = arith.divf %252, %253 : vector<1x32xf32>
    %255 = vector.extract_strided_slice %241 {offsets = [0, 64], sizes = [1, 32], strides = [1, 1]} : vector<1x96xf32> to vector<1x32xf32>
    %256 = math.tanh %255 : vector<1x32xf32>
    %257 = arith.mulf %248, %256 : vector<1x32xf32>
    %258 = arith.addf %257, %242 : vector<1x32xf32>
    %259 = math.tanh %258 : vector<1x32xf32>
    %260 = arith.mulf %254, %259 : vector<1x32xf32>
    %261 = arith.index_cast %c7_i32 : i32 to index
    %c0_60 = arith.constant 0 : index
    %262 = vector.load %arg18[%261, %c0_60] : memref<8x32xf32, #tpu.memory_space<vmem>>, vector<1x32xf32>
    tpu.vector_store %arg18[%261, %c0_60], %260 {strides = array<i32>} : memref<8x32xf32, #tpu.memory_space<vmem>>, vector<1x32xf32>,
    %c7_i32_61 = arith.constant 7 : i32
    %c0_62 = arith.constant 0 : index
    %c0_63 = arith.constant 0 : index
    %263 = vector.load %arg18[%c0_62, %c0_63] : memref<8x32xf32, #tpu.memory_space<vmem>>, vector<8x32xf32>
    %c0_64 = arith.constant 0 : index
    %c0_65 = arith.constant 0 : index
    %264 = vector.load %arg9[%c0_64, %c0_65] : memref<1x32xf32, #tpu.memory_space<vmem>>, vector<1x32xf32>
    %cst_66 = arith.constant dense<0.000000e+00> : vector<1x8xf32>
    %265 = tpu.matmul %264, %263, %cst_66 {dimension_numbers = #tpu.dot_dimension_numbers<[1], [1], [0], [0], [0, 0, 1, 0], [], []>} : vector<1x32xf32>, vector<8x32xf32>, vector<1x8xf32> -> vector<1x8xf32>
    %c0_67 = arith.constant 0 : index
    %c0_68 = arith.constant 0 : index
    %266 = vector.load %arg10[%c0_67, %c0_68] : memref<1x1xf32, #tpu.memory_space<vmem>>, vector<1x1xf32>
    %267 = vector.broadcast %266 : vector<1x1xf32> to vector<1x8xf32>
    %268 = arith.addf %265, %267 : vector<1x8xf32>
    %c0_69 = arith.constant 0 : index
    %c0_70 = arith.constant 0 : index
    %269 = vector.load %arg4[%c0_69, %c0_70] : memref<1x8xf32, #tpu.memory_space<vmem>>, vector<1x8xf32>
    %270 = arith.mulf %268, %269 : vector<1x8xf32>
    %c0_71 = arith.constant 0 : index
    %c0_72 = arith.constant 0 : index
    %271 = vector.load %arg5[%c0_71, %c0_72] : memref<1x8xf32, #tpu.memory_space<vmem>>, vector<1x8xf32>
    %272 = arith.mulf %268, %271 : vector<1x8xf32>
    %c0_73 = arith.constant 0 : index
    %c0_74 = arith.constant 0 : index
    %273 = vector.load %arg14[%c0_73, %c0_74] : memref<1x8xf32, #tpu.memory_space<vmem>>, vector<1x8xf32>
    tpu.vector_store %arg14[%c0_73, %c0_74], %270 {strides = array<i32>} : memref<1x8xf32, #tpu.memory_space<vmem>>, vector<1x8xf32>,
    %c0_75 = arith.constant 0 : index
    %c0_76 = arith.constant 0 : index
    %274 = vector.load %arg15[%c0_75, %c0_76] : memref<1x8xf32, #tpu.memory_space<vmem>>, vector<1x8xf32>
    tpu.vector_store %arg15[%c0_75, %c0_76], %272 {strides = array<i32>} : memref<1x8xf32, #tpu.memory_space<vmem>>, vector<1x8xf32>,
    %c0_77 = arith.constant 0 : index
    %c0_78 = arith.constant 0 : index
    %275 = vector.load %arg12[%c0_77, %c0_78] : memref<4x1xf32, #tpu.memory_space<vmem>>, vector<4x1xf32>
    %c0_79 = arith.constant 0 : index
    %c0_80 = arith.constant 0 : index
    %276 = vector.load %arg11[%c0_79, %c0_80] : memref<1x8xf32, #tpu.memory_space<vmem>>, vector<1x8xf32>
    %277 = vector.broadcast %275 : vector<4x1xf32> to vector<4x8xf32>
    %278 = vector.broadcast %276 : vector<1x8xf32> to vector<4x8xf32>
    %279 = arith.cmpf oeq, %277, %278 : vector<4x8xf32>
    %280 = arith.extui %279 : vector<4x8xi1> to vector<4x8xi32>
    %281 = arith.sitofp %280 : vector<4x8xi32> to vector<4x8xf32>
    %cst_81 = arith.constant dense<0.000000e+00> : vector<1x4xf32>
    %282 = tpu.matmul %270, %281, %cst_81 {dimension_numbers = #tpu.dot_dimension_numbers<[1], [1], [0], [0], [0, 0, 1, 0], [], []>} : vector<1x8xf32>, vector<4x8xf32>, vector<1x4xf32> -> vector<1x4xf32>
    %cst_82 = arith.constant dense<0.000000e+00> : vector<1x4xf32>
    %283 = tpu.matmul %272, %281, %cst_82 {dimension_numbers = #tpu.dot_dimension_numbers<[1], [1], [0], [0], [0, 0, 1, 0], [], []>} : vector<1x8xf32>, vector<4x8xf32>, vector<1x4xf32> -> vector<1x4xf32>
    %cst_83 = arith.constant 1.000000e+00 : f32
    %284 = vector.broadcast %cst_83 : f32 to vector<1x8xf32>
    %cst_84 = arith.constant dense<0.000000e+00> : vector<1x4xf32>
    %285 = tpu.matmul %284, %281, %cst_84 {dimension_numbers = #tpu.dot_dimension_numbers<[1], [1], [0], [0], [0, 0, 1, 0], [], []>} : vector<1x8xf32>, vector<4x8xf32>, vector<1x4xf32> -> vector<1x4xf32>
    %cst_85 = arith.constant 1.000000e+00 : f32
    %286 = vector.broadcast %cst_85 : f32 to vector<1x4xf32>
    %287 = arith.maximumf %285, %286 : vector<1x4xf32>
    %288 = arith.divf %282, %287 : vector<1x4xf32>
    %289 = arith.divf %283, %287 : vector<1x4xf32>
    %c0_86 = arith.constant 0 : index
    %c0_87 = arith.constant 0 : index
    %290 = vector.load %arg13[%c0_86, %c0_87] : memref<2x4xf32, #tpu.memory_space<vmem>>, vector<1x4xf32>
    %c1 = arith.constant 1 : index
    %c0_88 = arith.constant 0 : index
    %291 = vector.load %arg13[%c1, %c0_88] : memref<2x4xf32, #tpu.memory_space<vmem>>, vector<1x4xf32>
    %cst_89 = arith.constant 5.000000e-01 : f32
    %292 = vector.broadcast %cst_89 : f32 to vector<1x4xf32>
    %293 = arith.mulf %292, %288 : vector<1x4xf32>
    %294 = arith.maximumf %288, %289 : vector<1x4xf32>
    %cst_90 = arith.constant 5.000000e-01 : f32
    %295 = vector.broadcast %cst_90 : f32 to vector<1x4xf32>
    %296 = arith.mulf %295, %294 : vector<1x4xf32>
    %297 = arith.addf %293, %296 : vector<1x4xf32>
    %cst_91 = arith.constant 5.000000e-01 : f32
    %298 = vector.broadcast %cst_91 : f32 to vector<1x4xf32>
    %299 = arith.mulf %298, %290 : vector<1x4xf32>
    %300 = arith.maximumf %290, %291 : vector<1x4xf32>
    %cst_92 = arith.constant 5.000000e-01 : f32
    %301 = vector.broadcast %cst_92 : f32 to vector<1x4xf32>
    %302 = arith.mulf %301, %300 : vector<1x4xf32>
    %303 = arith.addf %299, %302 : vector<1x4xf32>
    %cst_93 = arith.constant 0.000000e+00 : f32
    %304 = vector.broadcast %cst_93 : f32 to vector<1x4xf32>
    %305 = arith.cmpf ogt, %285, %304 : vector<1x4xf32>
    %306 = arith.select %305, %297, %303 : vector<1x4xi1>, vector<1x4xf32>
    %c0_94 = arith.constant 0 : index
    %c0_95 = arith.constant 0 : index
    %307 = vector.load %arg16[%c0_94, %c0_95] : memref<1x4xf32, #tpu.memory_space<vmem>>, vector<1x4xf32>
    tpu.vector_store %arg16[%c0_94, %c0_95], %306 {strides = array<i32>} : memref<1x4xf32, #tpu.memory_space<vmem>>, vector<1x4xf32>,
    return
  }
  func.func @transform_0(%arg0: i32) -> (i32, i32) {
    %c0_i32 = arith.constant 0 : i32
    %c0_i32_0 = arith.constant 0 : i32
    %c0_i32_1 = arith.constant 0 : i32
    return %c0_i32, %c0_i32_0 : i32, i32
  }
  func.func @transform_1(%arg0: i32) -> (i32, i32) {
    %c0_i32 = arith.constant 0 : i32
    %c0_i32_0 = arith.constant 0 : i32
    %c0_i32_1 = arith.constant 0 : i32
    return %c0_i32, %c0_i32_0 : i32, i32
  }
  func.func @transform_2(%arg0: i32) -> (i32, i32) {
    %c0_i32 = arith.constant 0 : i32
    %c0_i32_0 = arith.constant 0 : i32
    %c0_i32_1 = arith.constant 0 : i32
    return %c0_i32, %c0_i32_0 : i32, i32
  }
  func.func @transform_3(%arg0: i32) -> (i32, i32) {
    %c0_i32 = arith.constant 0 : i32
    %c0_i32_0 = arith.constant 0 : i32
    %c0_i32_1 = arith.constant 0 : i32
    return %c0_i32, %c0_i32_0 : i32, i32
  }
  func.func @transform_4(%arg0: i32) -> (i32, i32) {
    %c0_i32 = arith.constant 0 : i32
    %c0_i32_0 = arith.constant 0 : i32
    %c0_i32_1 = arith.constant 0 : i32
    return %c0_i32, %c0_i32_0 : i32, i32
  }
  func.func @transform_5(%arg0: i32) -> (i32, i32) {
    %c0_i32 = arith.constant 0 : i32
    %c0_i32_0 = arith.constant 0 : i32
    %c0_i32_1 = arith.constant 0 : i32
    return %c0_i32, %c0_i32_0 : i32, i32
  }
  func.func @transform_6(%arg0: i32) -> (i32, i32) {
    %c0_i32 = arith.constant 0 : i32
    %c0_i32_0 = arith.constant 0 : i32
    %c0_i32_1 = arith.constant 0 : i32
    return %c0_i32, %c0_i32_0 : i32, i32
  }
  func.func @transform_7(%arg0: i32) -> (i32, i32) {
    %c0_i32 = arith.constant 0 : i32
    %c0_i32_0 = arith.constant 0 : i32
    %c0_i32_1 = arith.constant 0 : i32
    return %c0_i32, %c0_i32_0 : i32, i32
  }
  func.func @transform_8(%arg0: i32) -> (i32, i32) {
    %c0_i32 = arith.constant 0 : i32
    %c0_i32_0 = arith.constant 0 : i32
    %c0_i32_1 = arith.constant 0 : i32
    return %c0_i32, %c0_i32_0 : i32, i32
  }
  func.func @transform_9(%arg0: i32) -> (i32, i32) {
    %c0_i32 = arith.constant 0 : i32
    %c0_i32_0 = arith.constant 0 : i32
    %c0_i32_1 = arith.constant 0 : i32
    return %c0_i32, %c0_i32_0 : i32, i32
  }
  func.func @transform_10(%arg0: i32) -> (i32, i32) {
    %c0_i32 = arith.constant 0 : i32
    %c0_i32_0 = arith.constant 0 : i32
    %c0_i32_1 = arith.constant 0 : i32
    return %c0_i32, %c0_i32_0 : i32, i32
  }
  func.func @transform_11(%arg0: i32) -> (i32, i32) {
    %c0_i32 = arith.constant 0 : i32
    %c0_i32_0 = arith.constant 0 : i32
    %c0_i32_1 = arith.constant 0 : i32
    return %c0_i32, %c0_i32_0 : i32, i32
  }
  func.func @transform_12(%arg0: i32) -> (i32, i32) {
    %c0_i32 = arith.constant 0 : i32
    %c0_i32_0 = arith.constant 0 : i32
    %c0_i32_1 = arith.constant 0 : i32
    return %c0_i32, %c0_i32_0 : i32, i32
  }
  func.func @transform_13(%arg0: i32) -> (i32, i32) {
    %c0_i32 = arith.constant 0 : i32
    %c0_i32_0 = arith.constant 0 : i32
    %c0_i32_1 = arith.constant 0 : i32
    return %c0_i32, %c0_i32_0 : i32, i32
  }
  func.func @transform_14(%arg0: i32) -> (i32, i32) {
    %c0_i32 = arith.constant 0 : i32
    %c0_i32_0 = arith.constant 0 : i32
    %c0_i32_1 = arith.constant 0 : i32
    return %c0_i32, %c0_i32_0 : i32, i32
  }
  func.func @transform_15(%arg0: i32) -> (i32, i32) {
    %c0_i32 = arith.constant 0 : i32
    %c0_i32_0 = arith.constant 0 : i32
    %c0_i32_1 = arith.constant 0 : i32
    return %c0_i32, %c0_i32_0 : i32, i32
  }
}

</mosaic_0001>

<bundles_post_ra>
// kernel: tpu_custom_call.1
= control target key start
LH: loop header
LB: loop body
LE: loop exit
PB: predicated region body
PF: predicated region fallthrough
CT: control target
= control target key end

     0   :  { %s1955_s0 = inlined_call_operand.vmem [shape: bf16[8,16], index: 0, kind: input, shape index: {}]   ;;  %s1956_s1 = inlined_call_operand.vmem [shape: f32[8,96], index: 1, kind: input, shape index: {}]   ;;  %s1957_s2 = inlined_call_operand.hbm [shape: f32[8,32], index: 2, kind: input, shape index: {}]   ;;  %s1958_s3 = inlined_call_operand.vmem [shape: f32[1,8], index: 3, kind: input, shape index: {}]   ;;  %s1959_s4 = inlined_call_operand.hbm [shape: f32[1,8], index: 4, kind: input, shape index: {}]   ;;  %s1960_s5 = inlined_call_operand.hbm [shape: bf16[16,128], index: 5, kind: input, shape index: {}]   ;;  %s1961_s6 = inlined_call_operand.hbm [shape: f32[1,128], index: 6, kind: input, shape index: {}]   ;;  %s1962_s7 = inlined_call_operand.vmem [shape: bf16[32,128], index: 7, kind: input, shape index: {}]   ;;  %s1963_s8 = inlined_call_operand.vmem [shape: f32[1,32], index: 8, kind: input, shape index: {}]   ;;  %s1964_s9 = inlined_call_operand.<no memory space> [shape: f32[1,1], index: 9, kind: input, shape index: {}]   ;;  %s1965_s10 = inlined_call_operand.vmem [shape: f32[1,8], index: 10, kind: input, shape index: {}]   ;;  %s1966_s11 = inlined_call_operand.vmem [shape: f32[4,1], index: 11, kind: input, shape index: {}]   ;;  %s1967_s12 = inlined_call_operand.vmem [shape: f32[2,4], index: 12, kind: input, shape index: {}]   ;;  %s1968_s13 = inlined_call_operand.hbm [shape: f32[1,8], index: 13, kind: output, shape index: {0}]   ;;  %s1969_s14 = inlined_call_operand.hbm [shape: f32[1,8], index: 14, kind: output, shape index: {1}]   ;;  %s1970_s15 = inlined_call_operand.hbm [shape: f32[1,4], index: 15, kind: output, shape index: {2}]  }
   0x1   :  { %v21_v0 = vstv %s1964_s9 }
   0x2   :  { %22 = vst [vmem:[#allocation4] sm:$0x1] %v21_v0 }
   0x3   :  { %23 = vsyncpa [#allocation6], 0 }
   0x4   :  { %24 = vsyncpa [#allocation9], 0 }
   0x5   :  { %25 = vsyncpa [#allocation12], 0 }
   0x6   :  { %26 = vsyncpa [#allocation7], 0 }
   0x7   :  { %27 = vsyncpa [#allocation15], 0  ;;  %s1579_s20 = smov [#allocation8]   ;;  %s1580_s22 = smov [#allocation5]  }
   0x8   :  { %s50_s21 = sshll.u32 %s1579_s20, 4  ;;  %s38_s23 = sshll.u32 %s1580_s22, 4  ;;  %s51_s21 = int_to_ptr.vmem [resolvable:$true] %s50_s21  ;;  %s39_s23 = int_to_ptr.vmem [resolvable:$true] %s38_s23 }
   0x9   :  { %s1415_s26 = scalar_lea.hbm %s1959_s4, 16 }
   0xa   :  { %p1416_p0 = scmp.ne.s32.totalorder %s1959_s4, %s1415_s26  ;;  %p1419_p1 = scmp.lt.u32.totalorder %s1415_s26, %s1959_s4 }
   0xc   :  { %p1421_p2 = pnand %p1419_p1, %p1416_p0 }
   0xe   :  { %1424 = shalt.err (!%p1421_p2)
}
   0xf   :  { %s1425_s30 = scalar_lea.vmem %s51_s21, 16  ;;  %s1429_s16 = scalar_lea.vmem %s51_s21, 32 }
  0x10   :  { %p1426_p3 = scmp.ne.s32.totalorder %s51_s21, %s1425_s30  ;;  %p1430_p4 = scmp.lt.s32.totalorder %s51_s21, %s51_s21 }
  0x11   :  { %p1431_p5 = scmp.lt.s32.totalorder %s1429_s16, %s1425_s30 }
  0x13   :  { %p1432_p6 = por %p1431_p5, %p1430_p4 }
  0x15   :  { %p1433_p7 = pnand %p1432_p6, %p1426_p3 }
  0x17   :  { %1436 = shalt.err (!%p1433_p7)
}
  0x18   :  { %53 = dma.hbm_to_vmem [thread:$0]  %s1959_s4, 16, %s51_s21, [#allocation9]  }
  0x19   :  { %s1437_s22 = scalar_lea.hbm %s1957_s2, 128 }
  0x1a   :  { %p1438_p8 = scmp.ne.s32.totalorder %s1957_s2, %s1437_s22  ;;  %p1441_p9 = scmp.lt.u32.totalorder %s1437_s22, %s1957_s2 }
  0x1c   :  { %p1443_p10 = pnand %p1441_p9, %p1438_p8 }
  0x1e   :  { %1446 = shalt.err (!%p1443_p10)
}
  0x1f   :  { %s1447_s28 = scalar_lea.vmem %s39_s23, 128  ;;  %p1452_p12 = scmp.lt.s32.totalorder %s39_s23, %s39_s23 }
  0x20   :  { %p1448_p11 = scmp.ne.s32.totalorder %s39_s23, %s1447_s28  ;;  %p1453_p13 = scmp.lt.s32.totalorder %s1447_s28, %s1447_s28 }
  0x22   :  { %p1454_p0 = por %p1453_p13, %p1452_p12 }
  0x24   :  { %p1455_p1 = pnand %p1454_p0, %p1448_p11 }
  0x26   :  { %1458 = shalt.err (!%p1455_p1)
}
  0x27   :  { %41 = dma.hbm_to_vmem [thread:$0]  %s1957_s2, 128, %s39_s23, [#allocation6]  }
  0x28   :  { %s1581_s9 = smov [#allocation10]   ;;  %s1459_s17 = scalar_lea.hbm %s1960_s5, 128 }
  0x29   :  { %s59_s29 = sshll.u32 %s1581_s9, 4  ;;  %p1460_p2 = scmp.ne.s32.totalorder %s1960_s5, %s1459_s17  ;;  %s60_s29 = int_to_ptr.vmem [resolvable:$true] %s59_s29 }
  0x2a   :  { %p1463_p3 = scmp.lt.u32.totalorder %s1459_s17, %s1960_s5 }
  0x2c   :  { %p1465_p4 = pnand %p1463_p3, %p1460_p2 }
  0x2e   :  { %1468 = shalt.err (!%p1465_p4)
}
  0x2f   :  { %s1469_s24 = scalar_lea.vmem %s60_s29, 128  ;;  %p1474_p6 = scmp.lt.s32.totalorder %s60_s29, %s60_s29 }
  0x30   :  { %p1470_p5 = scmp.ne.s32.totalorder %s60_s29, %s1469_s24  ;;  %p1475_p7 = scmp.lt.s32.totalorder %s1469_s24, %s1469_s24 }
  0x32   :  { %p1476_p8 = por %p1475_p7, %p1474_p6 }
  0x34   :  { %p1477_p9 = pnand %p1476_p8, %p1470_p5 }
  0x36   :  { %1480 = shalt.err (!%p1477_p9)
}
  0x37   :  { %s1582_s2 = smov 64   ;;  %s1583_s23 = smov 4  }
  0x38   :  { %65 = dma.hbm_to_vmem [thread:$0]  %s1960_s5, 128, %s60_s29, [#allocation9], %s1582_s2, %s1582_s2, %s1583_s23  }
  0x39   :  { %s1584_s27 = smov [#allocation11]   ;;  %s1481_s9 = scalar_lea.hbm %s1961_s6, 16 }
  0x3a   :  { %s72_s28 = sshll.u32 %s1584_s27, 4  ;;  %p1482_p10 = scmp.ne.s32.totalorder %s1961_s6, %s1481_s9  ;;  %s73_s28 = int_to_ptr.vmem [resolvable:$true] %s72_s28 }
  0x3b   :  { %p1485_p11 = scmp.lt.u32.totalorder %s1481_s9, %s1961_s6 }
  0x3d   :  { %p1487_p12 = pnand %p1485_p11, %p1482_p10 }
  0x3f   :  { %1490 = shalt.err (!%p1487_p12)
}
  0x40   :  { %s1491_s19 = scalar_lea.vmem %s73_s28, 16  ;;  %s1495_s5 = scalar_lea.vmem %s73_s28, 32 }
  0x41   :  { %p1492_p13 = scmp.ne.s32.totalorder %s73_s28, %s1491_s19  ;;  %p1496_p0 = scmp.lt.s32.totalorder %s73_s28, %s73_s28 }
  0x42   :  { %p1497_p1 = scmp.lt.s32.totalorder %s1495_s5, %s1491_s19 }
  0x44   :  { %p1498_p2 = por %p1497_p1, %p1496_p0 }
  0x46   :  { %p1499_p3 = pnand %p1498_p2, %p1492_p13 }
  0x48   :  { %1502 = shalt.err (!%p1499_p3)
}
  0x49   :  { %75 = dma.hbm_to_vmem [thread:$0]  %s1961_s6, 16, %s73_s28, [#allocation12]  }
  0x4a   :  { %1569 = dma.done.wait [#allocation6], 128  }
  0x4b   :  { %1570 = vsyncadd [#allocation6], 4294967168 }
  0x4c   :  { %1571 = dma.done.wait [#allocation9], 144  }
  0x4d   :  { %1572 = vsyncadd [#allocation9], 4294967152 }
  0x4e   :  { %1573 = dma.done.wait [#allocation12], 16  }
  0x4f   :  { %1574 = vsyncadd [#allocation12], 4294967280  ;;  %v1585_v1 = vmov 0.0   ;;  %vm1586_vm0 = vmmov 0   ;;  %v1346_v2 = vld [vmem:[#allocation10] sm:$0xff]   ;;  %vm117_vm1 = vcmask 130048  }
  0x50   :  { %1247 = vmatprep.subr.bf16.mxu0 %v1585_v1  ;;  %1249 = vmatprep.mubr.msk.bf16.mxu0 %vm1586_vm0, %v1585_v1  ;;  %v101_v3 = vld [vmem:[%s1955_s0] sm:$0xf]  ;;  %s1587_s25 = smov 32   ;;  %v169_v5 = vld [vmem:[#allocation5] sm:$0x1]  ;;  %v1754_v25 = vld [vmem:[%s1962_s7 + $0x8] sm:$0xff]  }
  0x51   :  { %1253 = vmatprep.subr.bf16.mxu1 %v1585_v1  ;;  %1257 = vmatprep.mubr.msk.bf16.mxu1 %vm1586_vm0, %v1585_v1  ;;  %v163_v4 = vld [vmem:[%s1956_s1] sm:$0x1]  ;;  %v1186_v6 = vld [vmem:[#allocation11] ss:$0 sm:$0xff]  ;;  %s1588_s28 = smov 96   ;;  %vm219_vm2 = vcmask 261120  }
  0x52   :  { %1248 = vmatpush3.bf16.msra.mxu0 %v1346_v2  ;;  %165 = vrot.lane.b32.xlu0 %v163_v4, %s1587_s25  ;;  %v1748_v24 = vld [vmem:[%s1962_s7] sm:$0xff]   ;;  %vm197_vm3 = vcmask 253952   ;;  %vm901_vm5 = vcmask 64512   ;;  %vm882_vm6 = vcmask 57344   ;;  %s1592_s16 = smov [#allocation13]  }
  0x53   :  { %1261 = vmatprep.subr.bf16.mxu0 %v1585_v1  ;;  %183 = vrot.lane.b32.xlu1 %v169_v5, %s1587_s25  ;;  %s1148_s17 = sshll.u32 %s1592_s16, 4  ;;  %s1149_s17 = int_to_ptr.vmem [resolvable:$true] %s1148_s17 }
  0x54   :  { %1254 = vmatpush3.bf16.msra.mxu1 %v1748_v24 }
  0x55   :  { %1250 = vmatmul.mubr.msk.bf16.vlgmr.msra.gmra.mrb[0].mxu0 %vm117_vm1, %v101_v3  ;;  %1255 = vmatprep.subr.bf16.mxu1 %v1585_v1 }
  0x56   :  { %1265 = vmatprep.mubr.msk.bf16.mxu0 %vm1586_vm0, %v1585_v1  ;;  %1262 = vmatpush3.bf16.msra.mxu0 %v1748_v24 }
  0x57   :  { %1263 = vmatprep.subr.bf16.mxu0 %v1585_v1 }
  0x58   :  { %1256 = vmatpush3.bf16.msra.mxu1 %v1754_v25 }
  0x59   :  { %1269 = vmatprep.subr.bf16.mxu1 %v1585_v1 }
  0x5a   :  { %1264 = vmatpush3.bf16.msra.mxu0 %v1754_v25 }
  0x5b   :  { %1277 = vmatprep.subr.bf16.mxu0 %v1585_v1 }
  0xc4   :  { %v166_v12 = vpop.permute.xlu0 %165 }
  0xc5   :  { %v184_v21 = vpop.permute.xlu1 %183 }
 0x128   :  { %v155_v7 = vpop.f32.mrb[0].mxu0 }
 0x129   :  { %v156_v8 = vadd.f32 %v1186_v6, %v155_v7  ;;  %v1251_v9 = vpop.f32.mrb[1].mxu0 }
 0x12a   :  { %v158_v10 = vpop.f32.mrb[2].mxu0 }
 0x12b   :  { %161 = vst [vmem:[#allocation2] sm:$0xff] %v156_v8  ;;  %v1252_v11 = vpop.f32.mrb[3].mxu0 }
 0x132   :  { %v162_v13 = vld [vmem:[#allocation2] sm:$0x1]  ;;  %v263_v32 = vld [vmem:[#allocation2 + $0x1] sm:$0x1]  ;;  %v345_v54 = vld [vmem:[#allocation2 + $0x2] sm:$0x1] }
 0x133   :  { %v168_v14 = vadd.f32 %v166_v12, %v162_v13  ;;  %v427_v13 = vld [vmem:[#allocation2 + $0x3] sm:$0x1] }
 0x135   :  { %1349 = vtanh.f32 %v168_v14  ;;  %v1189_v16 = vmul.f32 -1.442695, %v168_v14 }
 0x137   :  { %1351 = vpow2.f32 %v1189_v16 }
 0x13f   :  { %v1350_v15 = vpop.eup %1349 }
 0x140   :  { %178 = vrot.lane.b32.xlu0 %v1350_v15, %s1582_s2 }
 0x141   :  { %v1352_v17 = vpop.eup %1351 }
 0x142   :  { %v173_v18 = vadd.f32 1.0, %v1352_v17 }
 0x144   :  { %1353 = vrcp.f32 %v173_v18 }
 0x14e   :  { %v1354_v19 = vpop.eup %1353 }
 0x1b2   :  { %v179_v20 = vpop.permute.xlu0 %178 }
 0x1b3   :  { %v181_v22 = vmul.f32 %v1354_v19, %v179_v20 }
 0x1b5   :  { %v186_v23 = vadd.f32 %v184_v21, %v181_v22 }
 0x1b7   :  { %1355 = vtanh.f32 %v186_v23 }
 0x1c1   :  { %v1356_v26 = vpop.eup %1355 }
 0x1c2   :  { %189 = vrot.lane.b32.xlu1 %v1356_v26, %s1587_s25 }
 0x1c6   :  { %272 = vrot.lane.b32.xlu1 %v186_v23, %s1588_s28 }
 0x234   :  { %v190_v27 = vpop.permute.xlu1 %189 }
 0x235   :  { %v1765_v28 = vmul.f32 %v1354_v19, %v190_v27 }
 0x237   :  { %v203_v29 = vpack.c.bf16 %v1765_v28, %v1765_v28 }
 0x238   :  { %v273_v42 = vpop.permute.xlu1 %272 }
 0x239   :  { %205 = vrot.lane.b32.xlu0 %v203_v29, %s1582_s2 }
 0x2ab   :  { %v206_v30 = vpop.permute.xlu0 %205 }
 0x2ac   :  { %1258 = vmatmul.mubr.msk.bf16.vlgmr.msra.gmra.mrb[0].mxu1 %vm219_vm2, %v206_v30 }
 0x2ad   :  { %1270 = vmatpush3.bf16.msra.mxu1 %v1748_v24  ;;  %1273 = vmatprep.mubr.msk.bf16.mxu1 %vm1586_vm0, %v1585_v1 }
 0x2ae   :  { %1271 = vmatprep.subr.bf16.mxu1 %v1585_v1 }
 0x2b1   :  { %1272 = vmatpush3.bf16.msra.mxu1 %v1754_v25 }
 0x2b2   :  { %1285 = vmatprep.subr.bf16.mxu1 %v1585_v1 }
 0x37f   :  { %v257_v31 = vpop.f32.mrb[0].mxu1 }
 0x380   :  { %v264_v33 = vadd.f32 %v263_v32, %v257_v31  ;;  %v1259_v34 = vpop.f32.mrb[1].mxu1 }
 0x381   :  { %v260_v35 = vpop.f32.mrb[2].mxu1 }
 0x382   :  { %v1193_v36 = vmul.f32 -1.442695, %v264_v33  ;;  %1357 = vtanh.f32 %v264_v33  ;;  %v1260_v37 = vpop.f32.mrb[3].mxu1 }
 0x384   :  { %1359 = vpow2.f32 %v1193_v36 }
 0x38c   :  { %v1358_v38 = vpop.eup %1357 }
 0x38d   :  { %278 = vrot.lane.b32.xlu0 %v1358_v38, %s1582_s2  ;;  %v509_v38 = vld [vmem:[#allocation2 + $0x4] sm:$0x1] }
 0x38e   :  { %v1360_v39 = vpop.eup %1359 }
 0x38f   :  { %v268_v40 = vadd.f32 1.0, %v1360_v39 }
 0x391   :  { %1361 = vrcp.f32 %v268_v40 }
 0x39b   :  { %v1362_v41 = vpop.eup %1361 }
 0x39c   :  { %v275_v43 = vmul.f32 %v1362_v41, %v273_v42 }
 0x39e   :  { %283 = vrot.lane.b32.xlu1 %v275_v43, %s1587_s25 }
 0x3ff   :  { %v279_v44 = vpop.permute.xlu0 %278 }
 0x400   :  { %v281_v45 = vmul.f32 %v1362_v41, %v279_v44 }
 0x410   :  { %v284_v46 = vpop.permute.xlu1 %283 }
 0x411   :  { %v286_v47 = vadd.f32 %v284_v46, %v281_v45 }
 0x413   :  { %1363 = vtanh.f32 %v286_v47 }
 0x41d   :  { %v1364_v48 = vpop.eup %1363 }
 0x41e   :  { %289 = vrot.lane.b32.xlu0 %v1364_v48, %s1587_s25 }
 0x422   :  { %354 = vrot.lane.b32.xlu0 %v286_v47, %s1588_s28 }
 0x490   :  { %v290_v49 = vpop.permute.xlu0 %289 }
 0x491   :  { %v1781_v50 = vmul.f32 %v1362_v41, %v290_v49 }
 0x493   :  { %v298_v51 = vpack.c.bf16 %v1781_v50, %v1781_v50 }
 0x494   :  { %v355_v0 = vpop.permute.xlu0 %354 }
 0x495   :  { %300 = vrot.lane.b32.xlu1 %v298_v51, %s1582_s2 }
 0x507   :  { %v301_v52 = vpop.permute.xlu1 %300 }
 0x508   :  { %1266 = vmatmul.mubr.msk.bf16.vlgmr.msra.gmra.mrb[4].mxu0 %vm219_vm2, %v301_v52 }
 0x509   :  { %1278 = vmatpush3.bf16.msra.mxu0 %v1748_v24  ;;  %1281 = vmatprep.mubr.msk.bf16.mxu0 %vm1586_vm0, %v1585_v1 }
 0x50a   :  { %1279 = vmatprep.subr.bf16.mxu0 %v1585_v1 }
 0x50d   :  { %1280 = vmatpush3.bf16.msra.mxu0 %v1754_v25 }
 0x50e   :  { %1293 = vmatprep.subr.bf16.mxu0 %v1585_v1 }
 0x5db   :  { %v339_v53 = vpop.f32.mrb[4].mxu0 }
 0x5dc   :  { %v346_v55 = vadd.f32 %v345_v54, %v339_v53  ;;  %v1267_v56 = vpop.f32.mrb[5].mxu0 }
 0x5dd   :  { %v342_v57 = vpop.f32.mrb[6].mxu0 }
 0x5de   :  { %v1195_v58 = vmul.f32 -1.442695, %v346_v55  ;;  %1365 = vtanh.f32 %v346_v55  ;;  %v1268_v59 = vpop.f32.mrb[7].mxu0 }
 0x5e0   :  { %1367 = vpow2.f32 %v1195_v58 }
 0x5e8   :  { %v1366_v60 = vpop.eup %1365 }
 0x5e9   :  { %360 = vrot.lane.b32.xlu1 %v1366_v60, %s1582_s2 }
 0x5ea   :  { %v1368_v61 = vpop.eup %1367 }
 0x5eb   :  { %v350_v62 = vadd.f32 1.0, %v1368_v61  ;;  %v591_v61 = vld [vmem:[#allocation2 + $0x5] sm:$0x1] }
 0x5ed   :  { %1369 = vrcp.f32 %v350_v62 }
 0x5f7   :  { %v1370_v63 = vpop.eup %1369 }
 0x5f8   :  { %v357_v2 = vmul.f32 %v1370_v63, %v355_v0 }
 0x5fa   :  { %365 = vrot.lane.b32.xlu0 %v357_v2, %s1587_s25 }
 0x65b   :  { %v361_v3 = vpop.permute.xlu1 %360 }
 0x65c   :  { %v363_v4 = vmul.f32 %v1370_v63, %v361_v3 }
 0x66c   :  { %v366_v5 = vpop.permute.xlu0 %365 }
 0x66d   :  { %v368_v6 = vadd.f32 %v366_v5, %v363_v4 }
 0x66f   :  { %1371 = vtanh.f32 %v368_v6 }
 0x679   :  { %v1372_v7 = vpop.eup %1371 }
 0x67a   :  { %371 = vrot.lane.b32.xlu1 %v1372_v7, %s1587_s25 }
 0x67e   :  { %436 = vrot.lane.b32.xlu1 %v368_v6, %s1588_s28 }
 0x6ec   :  { %v372_v8 = vpop.permute.xlu1 %371 }
 0x6ed   :  { %v1797_v9 = vmul.f32 %v1370_v63, %v372_v8 }
 0x6ef   :  { %v380_v10 = vpack.c.bf16 %v1797_v9, %v1797_v9 }
 0x6f0   :  { %v437_v23 = vpop.permute.xlu1 %436 }
 0x6f1   :  { %382 = vrot.lane.b32.xlu0 %v380_v10, %s1582_s2 }
 0x763   :  { %v383_v11 = vpop.permute.xlu0 %382 }
 0x764   :  { %1274 = vmatmul.mubr.msk.bf16.vlgmr.msra.gmra.mrb[4].mxu1 %vm219_vm2, %v383_v11 }
 0x765   :  { %1286 = vmatpush3.bf16.msra.mxu1 %v1748_v24  ;;  %1289 = vmatprep.mubr.msk.bf16.mxu1 %vm1586_vm0, %v1585_v1 }
 0x766   :  { %1287 = vmatprep.subr.bf16.mxu1 %v1585_v1 }
 0x769   :  { %1288 = vmatpush3.bf16.msra.mxu1 %v1754_v25 }
 0x76a   :  { %1301 = vmatprep.subr.bf16.mxu1 %v1585_v1 }
 0x837   :  { %v421_v12 = vpop.f32.mrb[4].mxu1 }
 0x838   :  { %v428_v14 = vadd.f32 %v427_v13, %v421_v12  ;;  %v1275_v15 = vpop.f32.mrb[5].mxu1 }
 0x839   :  { %v424_v16 = vpop.f32.mrb[6].mxu1 }
 0x83a   :  { %v1197_v17 = vmul.f32 -1.442695, %v428_v14  ;;  %1373 = vtanh.f32 %v428_v14  ;;  %v1276_v18 = vpop.f32.mrb[7].mxu1 }
 0x83c   :  { %1375 = vpow2.f32 %v1197_v17 }
 0x844   :  { %v1374_v19 = vpop.eup %1373 }
 0x845   :  { %442 = vrot.lane.b32.xlu0 %v1374_v19, %s1582_s2  ;;  %v673_v19 = vld [vmem:[#allocation2 + $0x6] sm:$0x1] }
 0x846   :  { %v1376_v20 = vpop.eup %1375 }
 0x847   :  { %v432_v21 = vadd.f32 1.0, %v1376_v20 }
 0x849   :  { %1377 = vrcp.f32 %v432_v21 }
 0x853   :  { %v1378_v22 = vpop.eup %1377 }
 0x854   :  { %v439_v26 = vmul.f32 %v1378_v22, %v437_v23 }
 0x856   :  { %447 = vrot.lane.b32.xlu1 %v439_v26, %s1587_s25 }
 0x8b7   :  { %v443_v27 = vpop.permute.xlu0 %442 }
 0x8b8   :  { %v445_v29 = vmul.f32 %v1378_v22, %v443_v27 }
 0x8c8   :  { %v448_v30 = vpop.permute.xlu1 %447 }
 0x8c9   :  { %v450_v31 = vadd.f32 %v448_v30, %v445_v29 }
 0x8cb   :  { %1379 = vtanh.f32 %v450_v31 }
 0x8d5   :  { %v1380_v32 = vpop.eup %1379 }
 0x8d6   :  { %453 = vrot.lane.b32.xlu0 %v1380_v32, %s1587_s25 }
 0x8da   :  { %518 = vrot.lane.b32.xlu0 %v450_v31, %s1588_s28 }
 0x948   :  { %v454_v33 = vpop.permute.xlu0 %453 }
 0x949   :  { %v1813_v34 = vmul.f32 %v1378_v22, %v454_v33 }
 0x94b   :  { %v462_v35 = vpack.c.bf16 %v1813_v34, %v1813_v34 }
 0x94c   :  { %v519_v48 = vpop.permute.xlu0 %518 }
 0x94d   :  { %464 = vrot.lane.b32.xlu1 %v462_v35, %s1582_s2 }
 0x9bf   :  { %v465_v36 = vpop.permute.xlu1 %464 }
 0x9c0   :  { %1282 = vmatmul.mubr.msk.bf16.vlgmr.msra.gmra.mrb[8].mxu0 %vm219_vm2, %v465_v36 }
 0x9c1   :  { %1294 = vmatpush3.bf16.msra.mxu0 %v1748_v24  ;;  %1297 = vmatprep.mubr.msk.bf16.mxu0 %vm1586_vm0, %v1585_v1 }
 0x9c2   :  { %1295 = vmatprep.subr.bf16.mxu0 %v1585_v1 }
 0x9c5   :  { %1296 = vmatpush3.bf16.msra.mxu0 %v1754_v25 }
 0x9c6   :  { %1309 = vmatprep.subr.mxu0 %v1585_v1 }
 0xa93   :  { %v503_v37 = vpop.f32.mrb[8].mxu0 }
 0xa94   :  { %v510_v39 = vadd.f32 %v509_v38, %v503_v37  ;;  %v1283_v40 = vpop.f32.mrb[9].mxu0 }
 0xa95   :  { %v506_v41 = vpop.f32.mrb[10].mxu0 }
 0xa96   :  { %v1199_v42 = vmul.f32 -1.442695, %v510_v39  ;;  %1381 = vtanh.f32 %v510_v39  ;;  %v1284_v43 = vpop.f32.mrb[11].mxu0 }
 0xa98   :  { %1383 = vpow2.f32 %v1199_v42 }
 0xaa0   :  { %v1382_v44 = vpop.eup %1381 }
 0xaa1   :  { %524 = vrot.lane.b32.xlu1 %v1382_v44, %s1582_s2 }
 0xaa2   :  { %v1384_v45 = vpop.eup %1383 }
 0xaa3   :  { %v514_v46 = vadd.f32 1.0, %v1384_v45  ;;  %v755_v45 = vld [vmem:[#allocation2 + $0x7] sm:$0x1] }
 0xaa5   :  { %1385 = vrcp.f32 %v514_v46 }
 0xaaf   :  { %v1386_v47 = vpop.eup %1385 }
 0xab0   :  { %v521_v49 = vmul.f32 %v1386_v47, %v519_v48 }
 0xab2   :  { %529 = vrot.lane.b32.xlu0 %v521_v49, %s1587_s25 }
 0xb13   :  { %v525_v51 = vpop.permute.xlu1 %524 }
 0xb14   :  { %v527_v52 = vmul.f32 %v1386_v47, %v525_v51 }
 0xb24   :  { %v530_v53 = vpop.permute.xlu0 %529 }
 0xb25   :  { %v532_v54 = vadd.f32 %v530_v53, %v527_v52 }
 0xb27   :  { %1387 = vtanh.f32 %v532_v54 }
 0xb31   :  { %v1388_v55 = vpop.eup %1387 }
 0xb32   :  { %535 = vrot.lane.b32.xlu1 %v1388_v55, %s1587_s25 }
 0xb36   :  { %600 = vrot.lane.b32.xlu1 %v532_v54, %s1588_s28 }
 0xba4   :  { %v536_v56 = vpop.permute.xlu1 %535 }
 0xba5   :  { %v1829_v57 = vmul.f32 %v1386_v47, %v536_v56 }
 0xba7   :  { %v544_v58 = vpack.c.bf16 %v1829_v57, %v1829_v57 }
 0xba8   :  { %v601_v7 = vpop.permute.xlu1 %600 }
 0xba9   :  { %546 = vrot.lane.b32.xlu0 %v544_v58, %s1582_s2 }
 0xc1b   :  { %v547_v59 = vpop.permute.xlu0 %546 }
 0xc1c   :  { %1290 = vmatmul.mubr.msk.bf16.vlgmr.msra.gmra.mrb[8].mxu1 %vm219_vm2, %v547_v59 }
 0xc1d   :  { %1302 = vmatpush3.bf16.msra.mxu1 %v1748_v24  ;;  %1305 = vmatprep.mubr.msk.bf16.mxu1 %vm1586_vm0, %v1585_v1 }
 0xc1e   :  { %1303 = vmatprep.subr.bf16.mxu1 %v1585_v1 }
 0xc21   :  { %1304 = vmatpush3.bf16.msra.mxu1 %v1754_v25 }
 0xc22   :  { %1319 = vmatprep.subr.mxu1 %v1585_v1 }
 0xcef   :  { %v585_v60 = vpop.f32.mrb[8].mxu1 }
 0xcf0   :  { %v592_v62 = vadd.f32 %v591_v61, %v585_v60  ;;  %v1291_v63 = vpop.f32.mrb[9].mxu1 }
 0xcf1   :  { %v588_v0 = vpop.f32.mrb[10].mxu1 }
 0xcf2   :  { %v1201_v2 = vmul.f32 -1.442695, %v592_v62  ;;  %1389 = vtanh.f32 %v592_v62  ;;  %v1292_v3 = vpop.f32.mrb[11].mxu1 }
 0xcf4   :  { %1391 = vpow2.f32 %v1201_v2 }
 0xcfc   :  { %v1390_v4 = vpop.eup %1389 }
 0xcfd   :  { %606 = vrot.lane.b32.xlu0 %v1390_v4, %s1582_s2  ;;  %v792_v4 = vld [vmem:[#allocation4] sm:$0x1] }
 0xcfe   :  { %v1392_v24 = vpop.eup %1391 }
 0xcff   :  { %v596_v5 = vadd.f32 1.0, %v1392_v24  ;;  %v1589_v24 = vmov 0  }
 0xd00   :  { %1344 = vset.pattern.permute.xlu1 %v1589_v24  ;;  %1345 = vset.pattern.permute.xlu0 %v1589_v24 }
 0xd01   :  { %1393 = vrcp.f32 %v596_v5 }
 0xd0b   :  { %v1394_v6 = vpop.eup %1393 }
 0xd0c   :  { %v603_v25 = vmul.f32 %v1394_v6, %v601_v7 }
 0xd0e   :  { %611 = vrot.lane.b32.xlu1 %v603_v25, %s1587_s25 }
 0xd6f   :  { %v607_v8 = vpop.permute.xlu0 %606 }
 0xd70   :  { %v609_v10 = vmul.f32 %v1394_v6, %v607_v8  ;;  %v791_v8 = vld [vmem:[%s1963_s8] sm:$0x1] }
 0xd80   :  { %v612_v11 = vpop.permute.xlu1 %611 }
 0xd81   :  { %v614_v12 = vadd.f32 %v612_v11, %v609_v10  ;;  %v1208_v10 = vld [vmem:[%s1965_s10] ss:$0 sm:$0xff] }
 0xd83   :  { %1395 = vtanh.f32 %v614_v12 }
 0xd8d   :  { %v1396_v13 = vpop.eup %1395 }
 0xd8e   :  { %617 = vrot.lane.b32.xlu0 %v1396_v13, %s1587_s25  ;;  %v798_v13 = vlaneseq }
 0xd92   :  { %682 = vrot.lane.b32.xlu0 %v614_v12, %s1588_s28 }
 0xe00   :  { %v618_v14 = vpop.permute.xlu0 %617 }
 0xe01   :  { %v1845_v15 = vmul.f32 %v1394_v6, %v618_v14  ;;  %v799_v14 = vshrl.u32 %v798_v13, 7 }
 0xe03   :  { %v626_v16 = vpack.c.bf16 %v1845_v15, %v1845_v15 }
 0xe04   :  { %v683_v32 = vpop.permute.xlu0 %682 }
 0xe05   :  { %628 = vrot.lane.b32.xlu1 %v626_v16, %s1582_s2 }
 0xe77   :  { %v629_v17 = vpop.permute.xlu1 %628 }
 0xe78   :  { %1298 = vmatmul.mubr.msk.bf16.vlgmr.msra.gmra.mrb[12].mxu0 %vm219_vm2, %v629_v17 }
 0xe79   :  { %1311 = vmatprep.mubr.msk.f32.mxu0 %vm1586_vm0, %v1585_v1 }
 0xf4b   :  { %v667_v18 = vpop.f32.mrb[12].mxu0 }
 0xf4c   :  { %v674_v20 = vadd.f32 %v673_v19, %v667_v18  ;;  %v1299_v21 = vpop.f32.mrb[13].mxu0  ;;  %v878_v19 = vld [vmem:[%s1958_s3] sm:$0x1]  ;;  %s1591_s3 = smov [#allocation14]  }
 0xf4d   :  { %v670_v22 = vpop.f32.mrb[14].mxu0  ;;  %s1158_s10 = sshll.u32 %s1591_s3, 4  ;;  %s1159_s10 = int_to_ptr.vmem [resolvable:$true] %s1158_s10 }
 0xf4e   :  { %v1203_v23 = vmul.f32 -1.442695, %v674_v20  ;;  %1397 = vtanh.f32 %v674_v20  ;;  %v1300_v26 = vpop.f32.mrb[15].mxu0  ;;  %v880_v20 = vld [vmem:[#allocation8] sm:$0x1]  ;;  %s1503_s18 = scalar_lea.vmem %s1159_s10, 16  ;;  %p1508_p5 = scmp.lt.s32.totalorder %s1159_s10, %s1159_s10 }
 0xf4f   :  { %p1504_p4 = scmp.ne.s32.totalorder %s1159_s10, %s1503_s18  ;;  %s1507_s19 = scalar_lea.vmem %s1159_s10, 32 }
 0xf50   :  { %1399 = vpow2.f32 %v1203_v23  ;;  %p1509_p6 = scmp.lt.s32.totalorder %s1507_s19, %s1503_s18 }
 0xf52   :  { %p1510_p7 = por %p1509_p6, %p1508_p5 }
 0xf54   :  { %p1511_p8 = pnand %p1510_p7, %p1504_p4 }
 0xf58   :  { %v1398_v27 = vpop.eup %1397 }
 0xf59   :  { %688 = vrot.lane.b32.xlu1 %v1398_v27, %s1582_s2  ;;  %v1590_v27 = vmov 1.0  }
 0xf5a   :  { %v1400_v29 = vpop.eup %1399 }
 0xf5b   :  { %v678_v30 = vadd.f32 1.0, %v1400_v29 }
 0xf5d   :  { %1401 = vrcp.f32 %v678_v30 }
 0xf67   :  { %v1402_v31 = vpop.eup %1401 }
 0xf68   :  { %v685_v33 = vmul.f32 %v1402_v31, %v683_v32 }
 0xf6a   :  { %693 = vrot.lane.b32.xlu0 %v685_v33, %s1587_s25 }
 0xfcb   :  { %v689_v35 = vpop.permute.xlu1 %688 }
 0xfcc   :  { %v691_v36 = vmul.f32 %v1402_v31, %v689_v35 }
 0xfdc   :  { %v694_v37 = vpop.permute.xlu0 %693 }
 0xfdd   :  { %v696_v38 = vadd.f32 %v694_v37, %v691_v36 }
 0xfdf   :  { %1403 = vtanh.f32 %v696_v38 }
 0xfe9   :  { %v1404_v39 = vpop.eup %1403 }
 0xfea   :  { %699 = vrot.lane.b32.xlu1 %v1404_v39, %s1587_s25 }
 0xfee   :  { %764 = vrot.lane.b32.xlu1 %v696_v38, %s1588_s28 }
0x105c   :  { %v700_v40 = vpop.permute.xlu1 %699 }
0x105d   :  { %v702_v41 = vmul.f32 %v1402_v31, %v700_v40 }
0x105f   :  { %v708_v42 = vpack.c.bf16 %v702_v41, %v702_v41 }
0x1060   :  { %v765_v56 = vpop.permute.xlu1 %764 }
0x1061   :  { %710 = vrot.lane.b32.xlu0 %v708_v42, %s1582_s2 }
0x10d3   :  { %v711_v43 = vpop.permute.xlu0 %710 }
0x10d4   :  { %1306 = vmatmul.mubr.msk.bf16.vlgmr.msra.gmra.mrb[12].mxu1 %vm219_vm2, %v711_v43 }
0x10d5   :  { %1321 = vmatprep.mubr.msk.f32.mxu1 %vm1586_vm0, %v1585_v1 }
0x11a7   :  { %v749_v44 = vpop.f32.mrb[12].mxu1 }
0x11a8   :  { %v756_v46 = vadd.f32 %v755_v45, %v749_v44  ;;  %v1307_v47 = vpop.f32.mrb[13].mxu1 }
0x11a9   :  { %v752_v48 = vpop.f32.mrb[14].mxu1 }
0x11aa   :  { %v1205_v49 = vmul.f32 -1.442695, %v756_v46  ;;  %1405 = vtanh.f32 %v756_v46  ;;  %v1308_v51 = vpop.f32.mrb[15].mxu1 }
0x11ac   :  { %1407 = vpow2.f32 %v1205_v49 }
0x11b4   :  { %v1406_v52 = vpop.eup %1405 }
0x11b5   :  { %770 = vrot.lane.b32.xlu0 %v1406_v52, %s1582_s2 }
0x11b6   :  { %v1408_v53 = vpop.eup %1407 }
0x11b7   :  { %v760_v54 = vadd.f32 1.0, %v1408_v53 }
0x11b9   :  { %1409 = vrcp.f32 %v760_v54 }
0x11c3   :  { %v1410_v55 = vpop.eup %1409 }
0x11c4   :  { %v767_v58 = vmul.f32 %v1410_v55, %v765_v56 }
0x11c6   :  { %775 = vrot.lane.b32.xlu1 %v767_v58, %s1587_s25 }
0x11ca   :  { %194 = vrot.lane.b32.xlu1 %v1765_v28, %s1582_s2 }
0x11ce   :  { %376 = vrot.lane.b32.xlu1 %v1797_v9, %s1582_s2 }
0x11d2   :  { %540 = vrot.lane.b32.xlu1 %v1829_v57, %s1582_s2 }
0x11d6   :  { %704 = vrot.lane.b32.xlu1 %v702_v41, %s1582_s2 }
0x11da   :  { %795 = vperm.xlu1 %1344, %v792_v4  }
0x1227   :  { %v771_v59 = vpop.permute.xlu0 %770 }
0x1228   :  { %v773_v60 = vmul.f32 %v1410_v55, %v771_v59 }
0x1238   :  { %v776_v61 = vpop.permute.xlu1 %775 }
0x1239   :  { %v778_v62 = vadd.f32 %v776_v61, %v773_v60 }
0x123b   :  { %1411 = vtanh.f32 %v778_v62 }
0x123c   :  { %v195_v63 = vpop.permute.xlu1 %194 }
0x123d   :  { %198 = vst.msk [vmem:[#allocation3] sm:$0x1] %vm197_vm3, %v195_v63 }
0x1240   :  { %v377_v0 = vpop.permute.xlu1 %376 }
0x1241   :  { %379 = vst.msk [vmem:[#allocation3 + $0x2] sm:$0x1] %vm197_vm3, %v377_v0 }
0x1244   :  { %v541_v28 = vpop.permute.xlu1 %540 }
0x1245   :  { %v1412_v2 = vpop.eup %1411  ;;  %543 = vst.msk [vmem:[#allocation3 + $0x4] sm:$0x1] %vm197_vm3, %v541_v28 }
0x1246   :  { %781 = vrot.lane.b32.xlu0 %v1412_v2, %s1587_s25 }
0x1248   :  { %v705_v9 = vpop.permute.xlu1 %704 }
0x1249   :  { %707 = vst.msk [vmem:[#allocation3 + $0x6] sm:$0x1] %vm197_vm3, %v705_v9 }
0x124a   :  { %294 = vrot.lane.b32.xlu0 %v1781_v50, %s1582_s2  ;;  %v885_v50 = vld [vmem:[%s1966_s11] sm:$0xf] }
0x124e   :  { %458 = vrot.lane.b32.xlu0 %v1813_v34, %s1582_s2 }
0x1252   :  { %622 = vrot.lane.b32.xlu0 %v1845_v15, %s1582_s2  ;;  %v800_v15 = vsub.s32 0, %v799_v14 }
0x1259   :  { %v796_v16 = vpop.permute.xlu1 %795 }
0x125a   :  { %v801_v17 = vrot.slane %v796_v16, %v800_v15 }
0x12b8   :  { %v782_v57 = vpop.permute.xlu0 %781 }
0x12b9   :  { %v784_v3 = vmul.f32 %v1410_v55, %v782_v57 }
0x12bb   :  { %786 = vrot.lane.b32.xlu0 %v784_v3, %s1582_s2 }
0x12bc   :  { %v295_v5 = vpop.permute.xlu0 %294 }
0x12bd   :  { %297 = vst.msk [vmem:[#allocation3 + $0x1] sm:$0x1] %vm197_vm3, %v295_v5 }
0x12bf   :  { %889 = vperm.xlu0 %1345, %v885_v50  }
0x12c0   :  { %v459_v34 = vpop.permute.xlu0 %458 }
0x12c1   :  { %461 = vst.msk [vmem:[#allocation3 + $0x3] sm:$0x1] %vm197_vm3, %v459_v34 }
0x12c4   :  { %v623_v6 = vpop.permute.xlu0 %622 }
0x12c5   :  { %625 = vst.msk [vmem:[#allocation3 + $0x5] sm:$0x1] %vm197_vm3, %v623_v6 }
0x132d   :  { %v787_v7 = vpop.permute.xlu0 %786 }
0x132e   :  { %789 = vst.msk [vmem:[#allocation3 + $0x7] sm:$0x1] %vm197_vm3, %v787_v7 }
0x1335   :  { %v790_v25 = vld [vmem:[#allocation3] sm:$0xff] }
0x1336   :  { %1310 = vmatpush3.xpose.msk.msra.mxu0 %vm219_vm2, %v790_v25 }
0x1337   :  { %1314 = vmatprep.subr.mxu0 %v1585_v1 }
0x1339   :  { %1312 = vmatmul.mubr.msk.f32.vlgmr.msra.gmra.mrb[16].mxu0 %vm219_vm2, %v791_v8 }
0x133a   :  { %1316 = vmatprep.mubr.msk.f32.mxu0 %vm1586_vm0, %v1585_v1 }
0x133e   :  { %v890_v11 = vpop.permute.xlu0 %889 }
0x133f   :  { %vm898_vm4 = vcmp.eq.f32.partialorder %v890_v11, %v1208_v10 }
0x1340   :  { %v1209_v12 = vsel %vm898_vm4, 1.0, %v1585_v1 }
0x1341   :  { %1315 = vmatpush3.xpose.msk.msra.mxu0 %vm901_vm5, %v1209_v12  ;;  %1320 = vmatpush3.xpose.msk.msra.mxu1 %vm901_vm5, %v1209_v12 }
0x1342   :  { %1324 = vmatprep.subr.mxu0 %v1585_v1 }
0x140c   :  { %v874_v18 = vpop.f32.mrb[16].mxu0 }
0x140d   :  { %v875_v21 = vadd.f32 %v874_v18, %v801_v17  ;;  %v1313_v22 = vpop.f32.mrb[17].mxu0 }
0x140f   :  { %v879_v23 = vmul.f32 %v878_v19, %v875_v21  ;;  %v881_v26 = vmul.f32 %v880_v20, %v875_v21 }
0x1411   :  { %1317 = vmatmul.mubr.msk.f32.vlgmr.msra.gmra.mrb[18].mxu0 %vm901_vm5, %v879_v23  ;;  %1322 = vmatmul.mubr.msk.f32.vlgmr.msra.gmra.mrb[16].mxu1 %vm901_vm5, %v881_v26  ;;  %884 = vst.msk [vmem:[#allocation14] sm:$0x1] %vm882_vm6, %v881_v26  ;;  %883 = vst.msk [vmem:[#allocation13] sm:$0x1] %vm882_vm6, %v879_v23 }
0x1412   :  { %1325 = vmatpush3.xpose.msk.msra.mxu0 %vm901_vm5, %v1209_v12  ;;  %1326 = vmatprep.mubr.msk.f32.mxu0 %vm1586_vm0, %v1585_v1 }
0x1415   :  { %1327 = vmatmul.mubr.msk.f32.vlgmr.msra.gmra.mrb[20].mxu0 %vm901_vm5, %v1590_v27 }
0x1416   :  { %1514 = shalt.err (!%p1511_p8)
}
0x1417   :  { %s1515_s20 = scalar_lea.hbm %s1969_s14, 16 }
0x1418   :  { %p1516_p9 = scmp.ne.s32.totalorder %s1969_s14, %s1515_s20  ;;  %p1519_p10 = scmp.lt.u32.totalorder %s1515_s20, %s1969_s14 }
0x141a   :  { %p1521_p11 = pnand %p1519_p10, %p1516_p9 }
0x141c   :  { %1524 = shalt.err (!%p1521_p11)
}
0x141d   :  { %1161 = dma.vmem_to_hbm [thread:$0]  %s1159_s10, 16, %s1969_s14, [#allocation15]  }
0x141e   :  { %s1525_s1 = scalar_lea.vmem %s1149_s17, 16  ;;  %s1529_s26 = scalar_lea.vmem %s1149_s17, 32 }
0x141f   :  { %p1526_p12 = scmp.ne.s32.totalorder %s1149_s17, %s1525_s1  ;;  %p1530_p13 = scmp.lt.s32.totalorder %s1149_s17, %s1149_s17 }
0x1420   :  { %p1531_p0 = scmp.lt.s32.totalorder %s1529_s26, %s1525_s1 }
0x1422   :  { %p1532_p1 = por %p1531_p0, %p1530_p13 }
0x1424   :  { %p1533_p2 = pnand %p1532_p1, %p1526_p12 }
0x1426   :  { %1536 = shalt.err (!%p1533_p2)
}
0x1427   :  { %s1537_s7 = scalar_lea.hbm %s1968_s13, 16 }
0x1428   :  { %p1538_p3 = scmp.ne.s32.totalorder %s1968_s13, %s1537_s7  ;;  %p1541_p4 = scmp.lt.u32.totalorder %s1537_s7, %s1968_s13 }
0x142a   :  { %p1543_p5 = pnand %p1541_p4, %p1538_p3 }
0x142c   :  { %1546 = shalt.err (!%p1543_p5)
}
0x142d   :  { %1151 = dma.vmem_to_hbm [thread:$0]  %s1149_s17, 16, %s1968_s13, [#allocation7]   ;;  %v1128_v36 = vld [vmem:[%s1967_s12] sm:$0x1]  ;;  %v1129_v37 = vld [vmem:[%s1967_s12 + $0x1] sm:$0x1] }
0x142e   :  { %v1135_v38 = vmax.f32 %v1128_v36, %v1129_v37  ;;  %v1134_v42 = vmul.f32 0.5, %v1128_v36  ;;  %s1593_s13 = smov [#allocation16]   ;;  %vm1140_vm7 = vcmask 24576  }
0x142f   :  { %s1168_s16 = sshll.u32 %s1593_s13, 4  ;;  %s1169_s16 = int_to_ptr.vmem [resolvable:$true] %s1168_s16 }
0x1430   :  { %v1136_v43 = vmul.f32 0.5, %v1135_v38  ;;  %s1547_s17 = scalar_lea.vmem %s1169_s16, 16  ;;  %s1551_s12 = scalar_lea.vmem %s1169_s16, 32 }
0x1431   :  { %p1548_p6 = scmp.ne.s32.totalorder %s1169_s16, %s1547_s17  ;;  %p1552_p7 = scmp.lt.s32.totalorder %s1169_s16, %s1169_s16 }
0x1432   :  { %v1137_v47 = vadd.f32 %v1136_v43, %v1134_v42  ;;  %p1553_p8 = scmp.lt.s32.totalorder %s1551_s12, %s1547_s17 }
0x1434   :  { %p1554_p9 = por %p1553_p8, %p1552_p7 }
0x1436   :  { %p1555_p10 = pnand %p1554_p9, %p1548_p6 }
0x14e4   :  { %v974_v1 = vpop.f32.mrb[18].mxu0  ;;  %v1047_v29 = vpop.f32.mrb[16].mxu1 }
0x14e5   :  { %v1318_v30 = vpop.f32.mrb[19].mxu0  ;;  %v1323_v31 = vpop.f32.mrb[17].mxu1 }
0x14e8   :  { %v1120_v32 = vpop.f32.mrb[20].mxu0 }
0x14e9   :  { %v1124_v33 = vmax.f32 %v1120_v32, 1.0  ;;  %v1328_v35 = vpop.f32.mrb[21].mxu0  ;;  %vm1138_vm8 = vcmp.gt.f32.partialorder %v1120_v32, 0.0 }
0x14eb   :  { %1413 = vrcp.f32 %v1124_v33 }
0x14f5   :  { %v1414_v39 = vpop.eup %1413 }
0x14f6   :  { %v1126_v40 = vmul.f32 %v1414_v39, %v974_v1  ;;  %v1127_v41 = vmul.f32 %v1414_v39, %v1047_v29 }
0x14f8   :  { %v1131_v44 = vmax.f32 %v1126_v40, %v1127_v41  ;;  %v1130_v45 = vmul.f32 0.5, %v1126_v40 }
0x14fa   :  { %v1132_v46 = vmul.f32 0.5, %v1131_v44 }
0x14fc   :  { %v1133_v48 = vadd.f32 %v1132_v46, %v1130_v45 }
0x14fe   :  { %v1139_v49 = vsel %vm1138_vm8, %v1133_v48, %v1137_v47 }
0x14ff   :  { %1141 = vst.msk [vmem:[#allocation16] sm:$0x1] %vm1140_vm7, %v1139_v49 }
0x1500   :  { %1558 = shalt.err (!%p1555_p10)
}
0x1501   :  { %s1559_s5 = scalar_lea.hbm %s1970_s15, 16 }
0x1502   :  { %p1560_p11 = scmp.ne.s32.totalorder %s1970_s15, %s1559_s5  ;;  %p1563_p12 = scmp.lt.u32.totalorder %s1559_s5, %s1970_s15 }
0x1504   :  { %p1565_p13 = pnand %p1563_p12, %p1560_p11 }
0x1506   :  { %1568 = shalt.err (!%p1565_p13)
}
0x1507   :  { %1171 = dma.vmem_to_hbm [thread:$0]  %s1169_s16, 16, %s1970_s15, [#allocation15]  }
0x1508   :  { %1575 = dma.done.wait [#allocation7], 16  }
0x1509   :  { %1576 = vsyncadd [#allocation7], 4294967280 }
0x150a   :  { %1577 = dma.done.wait [#allocation15], 32  }
0x150b   :  { %1578 = vsyncadd [#allocation15], 4294967264 }
0x150c   :  { %1181 = vsyncpa [#allocation6], 1 }
0x150d   :  { %1182 = vsyncpa [#allocation9], 1 }
0x150e   :  { %1183 = vsyncpa [#allocation12], 1 }
0x150f   :  { %1184 = vsyncpa [#allocation7], 1 }
0x1510   :  { %1185 = vsyncpa [#allocation15], 1 }

</bundles_post_ra>
